<compile_context>
chip_gen: v7x
topology: tpu7x:2x2x1
jax: 0.10.0
libtpu: 0.0.40
codegen_flags: <defaults>
</compile_context>

<pallas_src>
import jax
import jax.numpy as jnp
from jax.experimental import pallas as pl
from jax.experimental.pallas import tpu as pltpu


def _make_fused_conv_kernel(KH, KW, Ho, Wo, Coutp):
    """Builds the fused conv(k=4,s=2,p=1) kernel for fixed static shapes."""

    def kernel(p00_ref, p01_ref, p10_ref, p11_ref, w_ref, b_ref, o_ref):
        # pXY_ref: (Hq, Wq, Cin) parity plane (row parity X, col parity Y) of
        #          the zero-padded input for the current batch element.
        # w_ref:   (KH*KW, Cin, Coutp) per-tap weights, Cout zero-padded to lanes.
        # b_ref:   (1, Coutp) bias row (zero-padded).
        # o_ref:   (Ho, Wo, Coutp) output block (lane-dense stores).
        planes = ((p00_ref, p01_ref), (p10_ref, p11_ref))
        acc = jnp.zeros((Ho, Wo, Coutp), jnp.float32)
        for dh in range(KH):
            ph, qh = dh % 2, dh // 2
            for dw in range(KW):
                pw, qw = dw % 2, dw // 2
                t = dh * KW + dw
                # Contiguous shifted window == this tap's im2col block, (Ho, Wo, Cin).
                x_tap = planes[ph][pw][pl.ds(qh, Ho), pl.ds(qw, Wo), :]
                # (Cin, Coutp) tap weights broadcast over the Ho "batch" dim so
                # the contraction is a plain batched matmul (MXU-friendly form).
                w_tap = jnp.broadcast_to(w_ref[t], (Ho,) + w_ref.shape[1:])
                acc = acc + jnp.einsum(
                    "hwc,hcd->hwd", x_tap, w_tap,
                    preferred_element_type=jnp.float32)
        o_ref[...] = (acc + b_ref[...]).astype(o_ref.dtype)

    return kernel


def enc_block_v3_forward(x_nchw, weight, bias):
    """Forward of enc_block_v3: Conv2d(kernel=4, stride=2, pad=1, bias), NCHW in/out."""
    N, Cin, H, W = x_nchw.shape
    Cout, Cin_w, KH, KW = weight.shape
    assert Cin_w == Cin and (KH, KW) == (4, 4)
    stride, pad = 2, 1
    assert H % 2 == 0 and W % 2 == 0, "enc_block_v3 (k=4,s=2,p=1) expects even H, W"
    Ho = (H + 2 * pad - KH) // stride + 1
    Wo = (W + 2 * pad - KW) // stride + 1
    Hq, Wq = Ho + 1, Wo + 1                       # parity-plane spatial extents
    Coutp = max(128, ((Cout + 127) // 128) * 128)  # lane-dense output channels

    # ---- glue (layout only, single pass over the input; no im2col blow-up) ----
    x = jnp.transpose(x_nchw, (0, 2, 3, 1))                       # NCHW -> NHWC
    xp = jnp.pad(x, ((0, 0), (pad, pad), (pad, pad), (0, 0)))     # zero padding
    # Parity (space-to-depth) split: plane[ph][pw][n, i, j, c] = xp[n, 2i+ph, 2j+pw, c]
    p00 = xp[:, 0::2, 0::2, :]
    p01 = xp[:, 0::2, 1::2, :]
    p10 = xp[:, 1::2, 0::2, :]
    p11 = xp[:, 1::2, 1::2, :]

    # conv weight (Cout, Cin, KH, KW) -> (KH*KW, Cin, Coutp); bias -> (1, Coutp)
    w = jnp.transpose(weight, (2, 3, 1, 0)).reshape(KH * KW, Cin, Cout)
    w = jnp.pad(w, ((0, 0), (0, 0), (0, Coutp - Cout))).astype(jnp.float32)
    b = jnp.pad(bias.astype(jnp.float32), (0, Coutp - Cout)).reshape(1, Coutp)

    kernel = _make_fused_conv_kernel(KH, KW, Ho, Wo, Coutp)

    plane_spec = pl.BlockSpec((None, Hq, Wq, Cin), lambda n: (n, 0, 0, 0))

    in_bytes = 4 * (4 * N * Hq * Wq * Cin)
    w_bytes = 4 * (KH * KW * Cin * Coutp + Coutp)
    out_bytes = 4 * (N * Ho * Wo * Coutp)
    cost = pl.CostEstimate(
        flops=2 * N * Ho * Wo * KH * KW * Cin * Cout,
        transcendentals=0,
        bytes_accessed=in_bytes + w_bytes + out_bytes,
    )

    out_p = pl.pallas_call(
        kernel,
        out_shape=jax.ShapeDtypeStruct((N, Ho, Wo, Coutp), x_nchw.dtype),
        grid=(N,),
        in_specs=[
            plane_spec, plane_spec, plane_spec, plane_spec,
            # Grid-invariant operands (fetched once; a single-buffer
            # pipeline_mode would shave a little VMEM, omitted for portability).
            pl.BlockSpec((KH * KW, Cin, Coutp), lambda n: (0, 0, 0)),
            pl.BlockSpec((1, Coutp), lambda n: (0, 0)),
        ],
        out_specs=pl.BlockSpec((None, Ho, Wo, Coutp), lambda n: (n, 0, 0, 0)),
        compiler_params=pltpu.CompilerParams(
            dimension_semantics=("parallel",),     # shards batch across TCs (v7x)
            vmem_limit_bytes=32 * 1024 * 1024,     # safe on v5e/v6e/v7x
        ),
        cost_estimate=cost,
    )(p00, p01, p10, p11, w, b)

    out = out_p[..., :Cout]                        # drop lane padding
    return jnp.transpose(out, (0, 3, 1, 2))        # NHWC -> NCHW


if __name__ == "__main__":
    # Small shapes consistent with the module: batch=2, nc_input=4,
    # spatial=16x16, nc_output=8.
    N, Cin, H, W = 2, 4, 16, 16
    Cout, KH, KW = 8, 4, 4

    key = jax.random.PRNGKey(0)
    kx, kw, kb = jax.random.split(key, 3)
    x = jax.random.normal(kx, (N, Cin, H, W), dtype=jnp.float32)
    # Deterministic synthetic parameters (PyTorch conv weight layout OIHW).
    weight = 0.1 * jax.random.normal(kw, (Cout, Cin, KH, KW), dtype=jnp.float32)
    bias = 0.1 * jax.random.normal(kb, (Cout,), dtype=jnp.float32)

    out = jax.block_until_ready(enc_block_v3_forward(x, weight, bias))

    # Reference check against XLA's conv (same semantics as nn.Conv2d).
    ref = jax.lax.conv_general_dilated(
        x, weight, window_strides=(2, 2), padding=((1, 1), (1, 1)),
        dimension_numbers=("NCHW", "OIHW", "NCHW"),
    ) + bias[None, :, None, None]

    assert out.shape == (N, Cout, H // 2, W // 2), out.shape
    assert jnp.allclose(out, ref, atol=5e-4, rtol=5e-4), \
        float(jnp.max(jnp.abs(out - ref)))

    print("KERNEL_OK")
</pallas_src>

<mosaic_0001>
module attributes {stable_mosaic.version = 11 : i64} {
  func.func @kernel(%arg0: i32, %arg1: memref<1x9x9x4xf32, #tpu.memory_space<vmem>>, %arg2: memref<1x9x9x4xf32, #tpu.memory_space<vmem>>, %arg3: memref<1x9x9x4xf32, #tpu.memory_space<vmem>>, %arg4: memref<1x9x9x4xf32, #tpu.memory_space<vmem>>, %arg5: memref<16x4x128xf32, #tpu.memory_space<vmem>>, %arg6: memref<1x128xf32, #tpu.memory_space<vmem>>, %arg7: memref<1x8x8x128xf32, #tpu.memory_space<vmem>>) attributes {dimension_semantics = [#tpu.dimension_semantics<parallel>], iteration_bounds = array<i64: 2>, scalar_prefetch = 0 : i64, scratch_operands = 0 : i64, tpu.core_type = #tpu.core_type<tc>, window_params = [{transform_indices = @transform_0, window_bounds = array<i64: 1, 9, 9, 4>}, {transform_indices = @transform_1, window_bounds = array<i64: 1, 9, 9, 4>}, {transform_indices = @transform_2, window_bounds = array<i64: 1, 9, 9, 4>}, {transform_indices = @transform_3, window_bounds = array<i64: 1, 9, 9, 4>}, {pipeline_mode = #tpu.pipeline_mode<synchronous>, transform_indices = @transform_4, window_bounds = array<i64: 16, 4, 128>}, {pipeline_mode = #tpu.pipeline_mode<synchronous>, transform_indices = @transform_5, window_bounds = array<i64: 1, 128>}, {transform_indices = @transform_6, window_bounds = array<i64: 1, 8, 8, 128>}]} {
    %cst = arith.constant 0.000000e+00 : f32
    %0 = vector.broadcast %cst : f32 to vector<8x8x128xf32>
    %c0 = arith.constant 0 : index
    %c0_0 = arith.constant 0 : index
    %c0_1 = arith.constant 0 : index
    %c0_2 = arith.constant 0 : index
    %1 = vector.load %arg1[%c0, %c0_0, %c0_1, %c0_2] : memref<1x9x9x4xf32, #tpu.memory_space<vmem>>, vector<1x8x8x4xf32>
    %2 = vector.shape_cast %1 : vector<1x8x8x4xf32> to vector<8x8x4xf32>
    %c0_3 = arith.constant 0 : index
    %c0_4 = arith.constant 0 : index
    %c0_5 = arith.constant 0 : index
    %3 = vector.load %arg5[%c0_3, %c0_4, %c0_5] : memref<16x4x128xf32, #tpu.memory_space<vmem>>, vector<1x4x128xf32>
    %4 = vector.shape_cast %3 : vector<1x4x128xf32> to vector<4x128xf32>
    %5 = vector.shape_cast %4 : vector<4x128xf32> to vector<1x4x128xf32>
    %6 = vector.broadcast %5 : vector<1x4x128xf32> to vector<8x4x128xf32>
    "tpu.trace_start"() <{level = 10 : i32, message = "hwc,hcd->hwd"}> : () -> ()
    %cst_6 = arith.constant dense<0.000000e+00> : vector<8x8x128xf32>
    %7 = tpu.matmul %2, %6, %cst_6 {dimension_numbers = #tpu.dot_dimension_numbers<[2], [1], [1], [2], [0, 0, 0, 1, 1, 2], [0], [0]>} : vector<8x8x4xf32>, vector<8x4x128xf32>, vector<8x8x128xf32> -> vector<8x8x128xf32>
    "tpu.trace_stop"() : () -> ()
    %8 = arith.addf %0, %7 : vector<8x8x128xf32>
    %c0_7 = arith.constant 0 : index
    %c0_8 = arith.constant 0 : index
    %c0_9 = arith.constant 0 : index
    %c0_10 = arith.constant 0 : index
    %9 = vector.load %arg2[%c0_7, %c0_8, %c0_9, %c0_10] : memref<1x9x9x4xf32, #tpu.memory_space<vmem>>, vector<1x8x8x4xf32>
    %10 = vector.shape_cast %9 : vector<1x8x8x4xf32> to vector<8x8x4xf32>
    %c1 = arith.constant 1 : index
    %c0_11 = arith.constant 0 : index
    %c0_12 = arith.constant 0 : index
    %11 = vector.load %arg5[%c1, %c0_11, %c0_12] : memref<16x4x128xf32, #tpu.memory_space<vmem>>, vector<1x4x128xf32>
    %12 = vector.shape_cast %11 : vector<1x4x128xf32> to vector<4x128xf32>
    %13 = vector.shape_cast %12 : vector<4x128xf32> to vector<1x4x128xf32>
    %14 = vector.broadcast %13 : vector<1x4x128xf32> to vector<8x4x128xf32>
    "tpu.trace_start"() <{level = 10 : i32, message = "hwc,hcd->hwd"}> : () -> ()
    %cst_13 = arith.constant dense<0.000000e+00> : vector<8x8x128xf32>
    %15 = tpu.matmul %10, %14, %cst_13 {dimension_numbers = #tpu.dot_dimension_numbers<[2], [1], [1], [2], [0, 0, 0, 1, 1, 2], [0], [0]>} : vector<8x8x4xf32>, vector<8x4x128xf32>, vector<8x8x128xf32> -> vector<8x8x128xf32>
    "tpu.trace_stop"() : () -> ()
    %16 = arith.addf %8, %15 : vector<8x8x128xf32>
    %c0_14 = arith.constant 0 : index
    %c0_15 = arith.constant 0 : index
    %c1_16 = arith.constant 1 : index
    %c0_17 = arith.constant 0 : index
    %17 = vector.load %arg1[%c0_14, %c0_15, %c1_16, %c0_17] : memref<1x9x9x4xf32, #tpu.memory_space<vmem>>, vector<1x8x8x4xf32>
    %18 = vector.shape_cast %17 : vector<1x8x8x4xf32> to vector<8x8x4xf32>
    %c2 = arith.constant 2 : index
    %c0_18 = arith.constant 0 : index
    %c0_19 = arith.constant 0 : index
    %19 = vector.load %arg5[%c2, %c0_18, %c0_19] : memref<16x4x128xf32, #tpu.memory_space<vmem>>, vector<1x4x128xf32>
    %20 = vector.shape_cast %19 : vector<1x4x128xf32> to vector<4x128xf32>
    %21 = vector.shape_cast %20 : vector<4x128xf32> to vector<1x4x128xf32>
    %22 = vector.broadcast %21 : vector<1x4x128xf32> to vector<8x4x128xf32>
    "tpu.trace_start"() <{level = 10 : i32, message = "hwc,hcd->hwd"}> : () -> ()
    %cst_20 = arith.constant dense<0.000000e+00> : vector<8x8x128xf32>
    %23 = tpu.matmul %18, %22, %cst_20 {dimension_numbers = #tpu.dot_dimension_numbers<[2], [1], [1], [2], [0, 0, 0, 1, 1, 2], [0], [0]>} : vector<8x8x4xf32>, vector<8x4x128xf32>, vector<8x8x128xf32> -> vector<8x8x128xf32>
    "tpu.trace_stop"() : () -> ()
    %24 = arith.addf %16, %23 : vector<8x8x128xf32>
    %c0_21 = arith.constant 0 : index
    %c0_22 = arith.constant 0 : index
    %c1_23 = arith.constant 1 : index
    %c0_24 = arith.constant 0 : index
    %25 = vector.load %arg2[%c0_21, %c0_22, %c1_23, %c0_24] : memref<1x9x9x4xf32, #tpu.memory_space<vmem>>, vector<1x8x8x4xf32>
    %26 = vector.shape_cast %25 : vector<1x8x8x4xf32> to vector<8x8x4xf32>
    %c3 = arith.constant 3 : index
    %c0_25 = arith.constant 0 : index
    %c0_26 = arith.constant 0 : index
    %27 = vector.load %arg5[%c3, %c0_25, %c0_26] : memref<16x4x128xf32, #tpu.memory_space<vmem>>, vector<1x4x128xf32>
    %28 = vector.shape_cast %27 : vector<1x4x128xf32> to vector<4x128xf32>
    %29 = vector.shape_cast %28 : vector<4x128xf32> to vector<1x4x128xf32>
    %30 = vector.broadcast %29 : vector<1x4x128xf32> to vector<8x4x128xf32>
    "tpu.trace_start"() <{level = 10 : i32, message = "hwc,hcd->hwd"}> : () -> ()
    %cst_27 = arith.constant dense<0.000000e+00> : vector<8x8x128xf32>
    %31 = tpu.matmul %26, %30, %cst_27 {dimension_numbers = #tpu.dot_dimension_numbers<[2], [1], [1], [2], [0, 0, 0, 1, 1, 2], [0], [0]>} : vector<8x8x4xf32>, vector<8x4x128xf32>, vector<8x8x128xf32> -> vector<8x8x128xf32>
    "tpu.trace_stop"() : () -> ()
    %32 = arith.addf %24, %31 : vector<8x8x128xf32>
    %c0_28 = arith.constant 0 : index
    %c0_29 = arith.constant 0 : index
    %c0_30 = arith.constant 0 : index
    %c0_31 = arith.constant 0 : index
    %33 = vector.load %arg3[%c0_28, %c0_29, %c0_30, %c0_31] : memref<1x9x9x4xf32, #tpu.memory_space<vmem>>, vector<1x8x8x4xf32>
    %34 = vector.shape_cast %33 : vector<1x8x8x4xf32> to vector<8x8x4xf32>
    %c4 = arith.constant 4 : index
    %c0_32 = arith.constant 0 : index
    %c0_33 = arith.constant 0 : index
    %35 = vector.load %arg5[%c4, %c0_32, %c0_33] : memref<16x4x128xf32, #tpu.memory_space<vmem>>, vector<1x4x128xf32>
    %36 = vector.shape_cast %35 : vector<1x4x128xf32> to vector<4x128xf32>
    %37 = vector.shape_cast %36 : vector<4x128xf32> to vector<1x4x128xf32>
    %38 = vector.broadcast %37 : vector<1x4x128xf32> to vector<8x4x128xf32>
    "tpu.trace_start"() <{level = 10 : i32, message = "hwc,hcd->hwd"}> : () -> ()
    %cst_34 = arith.constant dense<0.000000e+00> : vector<8x8x128xf32>
    %39 = tpu.matmul %34, %38, %cst_34 {dimension_numbers = #tpu.dot_dimension_numbers<[2], [1], [1], [2], [0, 0, 0, 1, 1, 2], [0], [0]>} : vector<8x8x4xf32>, vector<8x4x128xf32>, vector<8x8x128xf32> -> vector<8x8x128xf32>
    "tpu.trace_stop"() : () -> ()
    %40 = arith.addf %32, %39 : vector<8x8x128xf32>
    %c0_35 = arith.constant 0 : index
    %c0_36 = arith.constant 0 : index
    %c0_37 = arith.constant 0 : index
    %c0_38 = arith.constant 0 : index
    %41 = vector.load %arg4[%c0_35, %c0_36, %c0_37, %c0_38] : memref<1x9x9x4xf32, #tpu.memory_space<vmem>>, vector<1x8x8x4xf32>
    %42 = vector.shape_cast %41 : vector<1x8x8x4xf32> to vector<8x8x4xf32>
    %c5 = arith.constant 5 : index
    %c0_39 = arith.constant 0 : index
    %c0_40 = arith.constant 0 : index
    %43 = vector.load %arg5[%c5, %c0_39, %c0_40] : memref<16x4x128xf32, #tpu.memory_space<vmem>>, vector<1x4x128xf32>
    %44 = vector.shape_cast %43 : vector<1x4x128xf32> to vector<4x128xf32>
    %45 = vector.shape_cast %44 : vector<4x128xf32> to vector<1x4x128xf32>
    %46 = vector.broadcast %45 : vector<1x4x128xf32> to vector<8x4x128xf32>
    "tpu.trace_start"() <{level = 10 : i32, message = "hwc,hcd->hwd"}> : () -> ()
    %cst_41 = arith.constant dense<0.000000e+00> : vector<8x8x128xf32>
    %47 = tpu.matmul %42, %46, %cst_41 {dimension_numbers = #tpu.dot_dimension_numbers<[2], [1], [1], [2], [0, 0, 0, 1, 1, 2], [0], [0]>} : vector<8x8x4xf32>, vector<8x4x128xf32>, vector<8x8x128xf32> -> vector<8x8x128xf32>
    "tpu.trace_stop"() : () -> ()
    %48 = arith.addf %40, %47 : vector<8x8x128xf32>
    %c0_42 = arith.constant 0 : index
    %c0_43 = arith.constant 0 : index
    %c1_44 = arith.constant 1 : index
    %c0_45 = arith.constant 0 : index
    %49 = vector.load %arg3[%c0_42, %c0_43, %c1_44, %c0_45] : memref<1x9x9x4xf32, #tpu.memory_space<vmem>>, vector<1x8x8x4xf32>
    %50 = vector.shape_cast %49 : vector<1x8x8x4xf32> to vector<8x8x4xf32>
    %c6 = arith.constant 6 : index
    %c0_46 = arith.constant 0 : index
    %c0_47 = arith.constant 0 : index
    %51 = vector.load %arg5[%c6, %c0_46, %c0_47] : memref<16x4x128xf32, #tpu.memory_space<vmem>>, vector<1x4x128xf32>
    %52 = vector.shape_cast %51 : vector<1x4x128xf32> to vector<4x128xf32>
    %53 = vector.shape_cast %52 : vector<4x128xf32> to vector<1x4x128xf32>
    %54 = vector.broadcast %53 : vector<1x4x128xf32> to vector<8x4x128xf32>
    "tpu.trace_start"() <{level = 10 : i32, message = "hwc,hcd->hwd"}> : () -> ()
    %cst_48 = arith.constant dense<0.000000e+00> : vector<8x8x128xf32>
    %55 = tpu.matmul %50, %54, %cst_48 {dimension_numbers = #tpu.dot_dimension_numbers<[2], [1], [1], [2], [0, 0, 0, 1, 1, 2], [0], [0]>} : vector<8x8x4xf32>, vector<8x4x128xf32>, vector<8x8x128xf32> -> vector<8x8x128xf32>
    "tpu.trace_stop"() : () -> ()
    %56 = arith.addf %48, %55 : vector<8x8x128xf32>
    %c0_49 = arith.constant 0 : index
    %c0_50 = arith.constant 0 : index
    %c1_51 = arith.constant 1 : index
    %c0_52 = arith.constant 0 : index
    %57 = vector.load %arg4[%c0_49, %c0_50, %c1_51, %c0_52] : memref<1x9x9x4xf32, #tpu.memory_space<vmem>>, vector<1x8x8x4xf32>
    %58 = vector.shape_cast %57 : vector<1x8x8x4xf32> to vector<8x8x4xf32>
    %c7 = arith.constant 7 : index
    %c0_53 = arith.constant 0 : index
    %c0_54 = arith.constant 0 : index
    %59 = vector.load %arg5[%c7, %c0_53, %c0_54] : memref<16x4x128xf32, #tpu.memory_space<vmem>>, vector<1x4x128xf32>
    %60 = vector.shape_cast %59 : vector<1x4x128xf32> to vector<4x128xf32>
    %61 = vector.shape_cast %60 : vector<4x128xf32> to vector<1x4x128xf32>
    %62 = vector.broadcast %61 : vector<1x4x128xf32> to vector<8x4x128xf32>
    "tpu.trace_start"() <{level = 10 : i32, message = "hwc,hcd->hwd"}> : () -> ()
    %cst_55 = arith.constant dense<0.000000e+00> : vector<8x8x128xf32>
    %63 = tpu.matmul %58, %62, %cst_55 {dimension_numbers = #tpu.dot_dimension_numbers<[2], [1], [1], [2], [0, 0, 0, 1, 1, 2], [0], [0]>} : vector<8x8x4xf32>, vector<8x4x128xf32>, vector<8x8x128xf32> -> vector<8x8x128xf32>
    "tpu.trace_stop"() : () -> ()
    %64 = arith.addf %56, %63 : vector<8x8x128xf32>
    %c0_56 = arith.constant 0 : index
    %c1_57 = arith.constant 1 : index
    %c0_58 = arith.constant 0 : index
    %c0_59 = arith.constant 0 : index
    %65 = vector.load %arg1[%c0_56, %c1_57, %c0_58, %c0_59] : memref<1x9x9x4xf32, #tpu.memory_space<vmem>>, vector<1x8x8x4xf32>
    %66 = vector.shape_cast %65 : vector<1x8x8x4xf32> to vector<8x8x4xf32>
    %c8 = arith.constant 8 : index
    %c0_60 = arith.constant 0 : index
    %c0_61 = arith.constant 0 : index
    %67 = vector.load %arg5[%c8, %c0_60, %c0_61] : memref<16x4x128xf32, #tpu.memory_space<vmem>>, vector<1x4x128xf32>
    %68 = vector.shape_cast %67 : vector<1x4x128xf32> to vector<4x128xf32>
    %69 = vector.shape_cast %68 : vector<4x128xf32> to vector<1x4x128xf32>
    %70 = vector.broadcast %69 : vector<1x4x128xf32> to vector<8x4x128xf32>
    "tpu.trace_start"() <{level = 10 : i32, message = "hwc,hcd->hwd"}> : () -> ()
    %cst_62 = arith.constant dense<0.000000e+00> : vector<8x8x128xf32>
    %71 = tpu.matmul %66, %70, %cst_62 {dimension_numbers = #tpu.dot_dimension_numbers<[2], [1], [1], [2], [0, 0, 0, 1, 1, 2], [0], [0]>} : vector<8x8x4xf32>, vector<8x4x128xf32>, vector<8x8x128xf32> -> vector<8x8x128xf32>
    "tpu.trace_stop"() : () -> ()
    %72 = arith.addf %64, %71 : vector<8x8x128xf32>
    %c0_63 = arith.constant 0 : index
    %c1_64 = arith.constant 1 : index
    %c0_65 = arith.constant 0 : index
    %c0_66 = arith.constant 0 : index
    %73 = vector.load %arg2[%c0_63, %c1_64, %c0_65, %c0_66] : memref<1x9x9x4xf32, #tpu.memory_space<vmem>>, vector<1x8x8x4xf32>
    %74 = vector.shape_cast %73 : vector<1x8x8x4xf32> to vector<8x8x4xf32>
    %c9 = arith.constant 9 : index
    %c0_67 = arith.constant 0 : index
    %c0_68 = arith.constant 0 : index
    %75 = vector.load %arg5[%c9, %c0_67, %c0_68] : memref<16x4x128xf32, #tpu.memory_space<vmem>>, vector<1x4x128xf32>
    %76 = vector.shape_cast %75 : vector<1x4x128xf32> to vector<4x128xf32>
    %77 = vector.shape_cast %76 : vector<4x128xf32> to vector<1x4x128xf32>
    %78 = vector.broadcast %77 : vector<1x4x128xf32> to vector<8x4x128xf32>
    "tpu.trace_start"() <{level = 10 : i32, message = "hwc,hcd->hwd"}> : () -> ()
    %cst_69 = arith.constant dense<0.000000e+00> : vector<8x8x128xf32>
    %79 = tpu.matmul %74, %78, %cst_69 {dimension_numbers = #tpu.dot_dimension_numbers<[2], [1], [1], [2], [0, 0, 0, 1, 1, 2], [0], [0]>} : vector<8x8x4xf32>, vector<8x4x128xf32>, vector<8x8x128xf32> -> vector<8x8x128xf32>
    "tpu.trace_stop"() : () -> ()
    %80 = arith.addf %72, %79 : vector<8x8x128xf32>
    %c0_70 = arith.constant 0 : index
    %c1_71 = arith.constant 1 : index
    %c1_72 = arith.constant 1 : index
    %c0_73 = arith.constant 0 : index
    %81 = vector.load %arg1[%c0_70, %c1_71, %c1_72, %c0_73] : memref<1x9x9x4xf32, #tpu.memory_space<vmem>>, vector<1x8x8x4xf32>
    %82 = vector.shape_cast %81 : vector<1x8x8x4xf32> to vector<8x8x4xf32>
    %c10 = arith.constant 10 : index
    %c0_74 = arith.constant 0 : index
    %c0_75 = arith.constant 0 : index
    %83 = vector.load %arg5[%c10, %c0_74, %c0_75] : memref<16x4x128xf32, #tpu.memory_space<vmem>>, vector<1x4x128xf32>
    %84 = vector.shape_cast %83 : vector<1x4x128xf32> to vector<4x128xf32>
    %85 = vector.shape_cast %84 : vector<4x128xf32> to vector<1x4x128xf32>
    %86 = vector.broadcast %85 : vector<1x4x128xf32> to vector<8x4x128xf32>
    "tpu.trace_start"() <{level = 10 : i32, message = "hwc,hcd->hwd"}> : () -> ()
    %cst_76 = arith.constant dense<0.000000e+00> : vector<8x8x128xf32>
    %87 = tpu.matmul %82, %86, %cst_76 {dimension_numbers = #tpu.dot_dimension_numbers<[2], [1], [1], [2], [0, 0, 0, 1, 1, 2], [0], [0]>} : vector<8x8x4xf32>, vector<8x4x128xf32>, vector<8x8x128xf32> -> vector<8x8x128xf32>
    "tpu.trace_stop"() : () -> ()
    %88 = arith.addf %80, %87 : vector<8x8x128xf32>
    %c0_77 = arith.constant 0 : index
    %c1_78 = arith.constant 1 : index
    %c1_79 = arith.constant 1 : index
    %c0_80 = arith.constant 0 : index
    %89 = vector.load %arg2[%c0_77, %c1_78, %c1_79, %c0_80] : memref<1x9x9x4xf32, #tpu.memory_space<vmem>>, vector<1x8x8x4xf32>
    %90 = vector.shape_cast %89 : vector<1x8x8x4xf32> to vector<8x8x4xf32>
    %c11 = arith.constant 11 : index
    %c0_81 = arith.constant 0 : index
    %c0_82 = arith.constant 0 : index
    %91 = vector.load %arg5[%c11, %c0_81, %c0_82] : memref<16x4x128xf32, #tpu.memory_space<vmem>>, vector<1x4x128xf32>
    %92 = vector.shape_cast %91 : vector<1x4x128xf32> to vector<4x128xf32>
    %93 = vector.shape_cast %92 : vector<4x128xf32> to vector<1x4x128xf32>
    %94 = vector.broadcast %93 : vector<1x4x128xf32> to vector<8x4x128xf32>
    "tpu.trace_start"() <{level = 10 : i32, message = "hwc,hcd->hwd"}> : () -> ()
    %cst_83 = arith.constant dense<0.000000e+00> : vector<8x8x128xf32>
    %95 = tpu.matmul %90, %94, %cst_83 {dimension_numbers = #tpu.dot_dimension_numbers<[2], [1], [1], [2], [0, 0, 0, 1, 1, 2], [0], [0]>} : vector<8x8x4xf32>, vector<8x4x128xf32>, vector<8x8x128xf32> -> vector<8x8x128xf32>
    "tpu.trace_stop"() : () -> ()
    %96 = arith.addf %88, %95 : vector<8x8x128xf32>
    %c0_84 = arith.constant 0 : index
    %c1_85 = arith.constant 1 : index
    %c0_86 = arith.constant 0 : index
    %c0_87 = arith.constant 0 : index
    %97 = vector.load %arg3[%c0_84, %c1_85, %c0_86, %c0_87] : memref<1x9x9x4xf32, #tpu.memory_space<vmem>>, vector<1x8x8x4xf32>
    %98 = vector.shape_cast %97 : vector<1x8x8x4xf32> to vector<8x8x4xf32>
    %c12 = arith.constant 12 : index
    %c0_88 = arith.constant 0 : index
    %c0_89 = arith.constant 0 : index
    %99 = vector.load %arg5[%c12, %c0_88, %c0_89] : memref<16x4x128xf32, #tpu.memory_space<vmem>>, vector<1x4x128xf32>
    %100 = vector.shape_cast %99 : vector<1x4x128xf32> to vector<4x128xf32>
    %101 = vector.shape_cast %100 : vector<4x128xf32> to vector<1x4x128xf32>
    %102 = vector.broadcast %101 : vector<1x4x128xf32> to vector<8x4x128xf32>
    "tpu.trace_start"() <{level = 10 : i32, message = "hwc,hcd->hwd"}> : () -> ()
    %cst_90 = arith.constant dense<0.000000e+00> : vector<8x8x128xf32>
    %103 = tpu.matmul %98, %102, %cst_90 {dimension_numbers = #tpu.dot_dimension_numbers<[2], [1], [1], [2], [0, 0, 0, 1, 1, 2], [0], [0]>} : vector<8x8x4xf32>, vector<8x4x128xf32>, vector<8x8x128xf32> -> vector<8x8x128xf32>
    "tpu.trace_stop"() : () -> ()
    %104 = arith.addf %96, %103 : vector<8x8x128xf32>
    %c0_91 = arith.constant 0 : index
    %c1_92 = arith.constant 1 : index
    %c0_93 = arith.constant 0 : index
    %c0_94 = arith.constant 0 : index
    %105 = vector.load %arg4[%c0_91, %c1_92, %c0_93, %c0_94] : memref<1x9x9x4xf32, #tpu.memory_space<vmem>>, vector<1x8x8x4xf32>
    %106 = vector.shape_cast %105 : vector<1x8x8x4xf32> to vector<8x8x4xf32>
    %c13 = arith.constant 13 : index
    %c0_95 = arith.constant 0 : index
    %c0_96 = arith.constant 0 : index
    %107 = vector.load %arg5[%c13, %c0_95, %c0_96] : memref<16x4x128xf32, #tpu.memory_space<vmem>>, vector<1x4x128xf32>
    %108 = vector.shape_cast %107 : vector<1x4x128xf32> to vector<4x128xf32>
    %109 = vector.shape_cast %108 : vector<4x128xf32> to vector<1x4x128xf32>
    %110 = vector.broadcast %109 : vector<1x4x128xf32> to vector<8x4x128xf32>
    "tpu.trace_start"() <{level = 10 : i32, message = "hwc,hcd->hwd"}> : () -> ()
    %cst_97 = arith.constant dense<0.000000e+00> : vector<8x8x128xf32>
    %111 = tpu.matmul %106, %110, %cst_97 {dimension_numbers = #tpu.dot_dimension_numbers<[2], [1], [1], [2], [0, 0, 0, 1, 1, 2], [0], [0]>} : vector<8x8x4xf32>, vector<8x4x128xf32>, vector<8x8x128xf32> -> vector<8x8x128xf32>
    "tpu.trace_stop"() : () -> ()
    %112 = arith.addf %104, %111 : vector<8x8x128xf32>
    %c0_98 = arith.constant 0 : index
    %c1_99 = arith.constant 1 : index
    %c1_100 = arith.constant 1 : index
    %c0_101 = arith.constant 0 : index
    %113 = vector.load %arg3[%c0_98, %c1_99, %c1_100, %c0_101] : memref<1x9x9x4xf32, #tpu.memory_space<vmem>>, vector<1x8x8x4xf32>
    %114 = vector.shape_cast %113 : vector<1x8x8x4xf32> to vector<8x8x4xf32>
    %c14 = arith.constant 14 : index
    %c0_102 = arith.constant 0 : index
    %c0_103 = arith.constant 0 : index
    %115 = vector.load %arg5[%c14, %c0_102, %c0_103] : memref<16x4x128xf32, #tpu.memory_space<vmem>>, vector<1x4x128xf32>
    %116 = vector.shape_cast %115 : vector<1x4x128xf32> to vector<4x128xf32>
    %117 = vector.shape_cast %116 : vector<4x128xf32> to vector<1x4x128xf32>
    %118 = vector.broadcast %117 : vector<1x4x128xf32> to vector<8x4x128xf32>
    "tpu.trace_start"() <{level = 10 : i32, message = "hwc,hcd->hwd"}> : () -> ()
    %cst_104 = arith.constant dense<0.000000e+00> : vector<8x8x128xf32>
    %119 = tpu.matmul %114, %118, %cst_104 {dimension_numbers = #tpu.dot_dimension_numbers<[2], [1], [1], [2], [0, 0, 0, 1, 1, 2], [0], [0]>} : vector<8x8x4xf32>, vector<8x4x128xf32>, vector<8x8x128xf32> -> vector<8x8x128xf32>
    "tpu.trace_stop"() : () -> ()
    %120 = arith.addf %112, %119 : vector<8x8x128xf32>
    %c0_105 = arith.constant 0 : index
    %c1_106 = arith.constant 1 : index
    %c1_107 = arith.constant 1 : index
    %c0_108 = arith.constant 0 : index
    %121 = vector.load %arg4[%c0_105, %c1_106, %c1_107, %c0_108] : memref<1x9x9x4xf32, #tpu.memory_space<vmem>>, vector<1x8x8x4xf32>
    %122 = vector.shape_cast %121 : vector<1x8x8x4xf32> to vector<8x8x4xf32>
    %c15 = arith.constant 15 : index
    %c0_109 = arith.constant 0 : index
    %c0_110 = arith.constant 0 : index
    %123 = vector.load %arg5[%c15, %c0_109, %c0_110] : memref<16x4x128xf32, #tpu.memory_space<vmem>>, vector<1x4x128xf32>
    %124 = vector.shape_cast %123 : vector<1x4x128xf32> to vector<4x128xf32>
    %125 = vector.shape_cast %124 : vector<4x128xf32> to vector<1x4x128xf32>
    %126 = vector.broadcast %125 : vector<1x4x128xf32> to vector<8x4x128xf32>
    "tpu.trace_start"() <{level = 10 : i32, message = "hwc,hcd->hwd"}> : () -> ()
    %cst_111 = arith.constant dense<0.000000e+00> : vector<8x8x128xf32>
    %127 = tpu.matmul %122, %126, %cst_111 {dimension_numbers = #tpu.dot_dimension_numbers<[2], [1], [1], [2], [0, 0, 0, 1, 1, 2], [0], [0]>} : vector<8x8x4xf32>, vector<8x4x128xf32>, vector<8x8x128xf32> -> vector<8x8x128xf32>
    "tpu.trace_stop"() : () -> ()
    %128 = arith.addf %120, %127 : vector<8x8x128xf32>
    %c0_112 = arith.constant 0 : index
    %c0_113 = arith.constant 0 : index
    %129 = vector.load %arg6[%c0_112, %c0_113] : memref<1x128xf32, #tpu.memory_space<vmem>>, vector<1x128xf32>
    %130 = vector.shape_cast %129 : vector<1x128xf32> to vector<1x1x128xf32>
    %131 = vector.broadcast %130 : vector<1x1x128xf32> to vector<8x8x128xf32>
    %132 = arith.addf %128, %131 : vector<8x8x128xf32>
    %c0_114 = arith.constant 0 : index
    %c0_115 = arith.constant 0 : index
    %c0_116 = arith.constant 0 : index
    %c0_117 = arith.constant 0 : index
    %133 = vector.load %arg7[%c0_114, %c0_115, %c0_116, %c0_117] : memref<1x8x8x128xf32, #tpu.memory_space<vmem>>, vector<1x8x8x128xf32>
    %134 = vector.shape_cast %133 : vector<1x8x8x128xf32> to vector<8x8x128xf32>
    %135 = vector.shape_cast %132 : vector<8x8x128xf32> to vector<1x8x8x128xf32>
    tpu.vector_store %arg7[%c0_114, %c0_115, %c0_116, %c0_117], %135 {strides = array<i32>} : memref<1x8x8x128xf32, #tpu.memory_space<vmem>>, vector<1x8x8x128xf32>,
    return
  }
  func.func @transform_0(%arg0: i32) -> (i32, i32, i32, i32) {
    %c0_i32 = arith.constant 0 : i32
    %c0_i32_0 = arith.constant 0 : i32
    %c0_i32_1 = arith.constant 0 : i32
    %c0_i32_2 = arith.constant 0 : i32
    return %arg0, %c0_i32, %c0_i32_0, %c0_i32_1 : i32, i32, i32, i32
  }
  func.func @transform_1(%arg0: i32) -> (i32, i32, i32, i32) {
    %c0_i32 = arith.constant 0 : i32
    %c0_i32_0 = arith.constant 0 : i32
    %c0_i32_1 = arith.constant 0 : i32
    %c0_i32_2 = arith.constant 0 : i32
    return %arg0, %c0_i32, %c0_i32_0, %c0_i32_1 : i32, i32, i32, i32
  }
  func.func @transform_2(%arg0: i32) -> (i32, i32, i32, i32) {
    %c0_i32 = arith.constant 0 : i32
    %c0_i32_0 = arith.constant 0 : i32
    %c0_i32_1 = arith.constant 0 : i32
    %c0_i32_2 = arith.constant 0 : i32
    return %arg0, %c0_i32, %c0_i32_0, %c0_i32_1 : i32, i32, i32, i32
  }
  func.func @transform_3(%arg0: i32) -> (i32, i32, i32, i32) {
    %c0_i32 = arith.constant 0 : i32
    %c0_i32_0 = arith.constant 0 : i32
    %c0_i32_1 = arith.constant 0 : i32
    %c0_i32_2 = arith.constant 0 : i32
    return %arg0, %c0_i32, %c0_i32_0, %c0_i32_1 : i32, i32, i32, i32
  }
  func.func @transform_4(%arg0: i32) -> (i32, i32, i32) {
    %c0_i32 = arith.constant 0 : i32
    %c0_i32_0 = arith.constant 0 : i32
    %c0_i32_1 = arith.constant 0 : i32
    %c0_i32_2 = arith.constant 0 : i32
    return %c0_i32, %c0_i32_0, %c0_i32_1 : i32, i32, i32
  }
  func.func @transform_5(%arg0: i32) -> (i32, i32) {
    %c0_i32 = arith.constant 0 : i32
    %c0_i32_0 = arith.constant 0 : i32
    %c0_i32_1 = arith.constant 0 : i32
    return %c0_i32, %c0_i32_0 : i32, i32
  }
  func.func @transform_6(%arg0: i32) -> (i32, i32, i32, i32) {
    %c0_i32 = arith.constant 0 : i32
    %c0_i32_0 = arith.constant 0 : i32
    %c0_i32_1 = arith.constant 0 : i32
    %c0_i32_2 = arith.constant 0 : i32
    return %arg0, %c0_i32, %c0_i32_0, %c0_i32_1 : i32, i32, i32, i32
  }
}

</mosaic_0001>

<bundles_post_ra>
// kernel: tpu_custom_call.1
= control target key start
LH: loop header
LB: loop body
LE: loop exit
PB: predicated region body
PF: predicated region fallthrough
CT: control target
= control target key end

     0   :  { %11 = vsyncpa [#allocation3], 0  ;;  %s12637_s0 = inlined_call_operand.vmem [shape: f32[2,9,9,4], index: 0, kind: input, shape index: {}]   ;;  %s12638_s1 = inlined_call_operand.vmem [shape: f32[2,9,9,4], index: 1, kind: input, shape index: {}]   ;;  %s12639_s2 = inlined_call_operand.vmem [shape: f32[2,9,9,4], index: 2, kind: input, shape index: {}]   ;;  %s12640_s3 = inlined_call_operand.vmem [shape: f32[2,9,9,4], index: 3, kind: input, shape index: {}]   ;;  %s12641_s4 = inlined_call_operand.vmem [shape: f32[16,4,128], index: 4, kind: input, shape index: {}]   ;;  %s12642_s5 = inlined_call_operand.vmem [shape: f32[1,128], index: 5, kind: input, shape index: {}]   ;;  %s12643_s6 = inlined_call_operand.hbm [shape: f32[2,8,8,128], index: 6, kind: output, shape index: {}]  }
   0x1   :  { %13 = vsyncpa [#allocation3 + $0x1], 0  ;;  %s11509_s21 = smov 0   ;;  %s11511_s22 = smov 0  }
   0x2   :  { %s11513_s23 = smov 0   ;;  %s11515_s24 = smov 0  }
   0x3 LB: > { %s11530_s25 = sadd.s32 4294967295, %s11467_s24   ;;  %s10114_s26 = sadd.s32 4294967294, %s11467_s24   ;;  %s11467_s24 = sphi %s11515_s24, %s12649_s24   ;;  %s11463_s23 = sphi %s11513_s23, %s12648_s23   ;;  %s11459_s22 = sphi %s11511_s22, %s12647_s22   ;;  %s11455_s21 = sphi %s11509_s21, %s12646_s21  }
   0x4   : > { %s11534_s27 = sadd.s32 1, %s11467_s24   ;;  %s172_s28 = sadd.s32 1, %s11463_s23 }
   0x5   : > { %s169_s29 = ssub.s32 %s11467_s24, %s11534_s27  ;;  %p182_p0 = scmp.ne.s32.totalorder %s11463_s23, %s11459_s22 }
   0x6   : > { %p170_p1 = scmp.eq.s32.totalorder %s169_s29, 0  ;;  %p183_p2 = scmp.eq.s32.totalorder %s11530_s25, 1 }
   0x7   : > { %p188_p3 = scmp.ne.s32.totalorder %s11459_s22, %s11455_s21  ;;  %p189_p4 = scmp.eq.s32.totalorder %s10114_s26, 1 }
   0x8   : > { %s11545_s30 = scalar_select %p170_p1, %s11463_s23, %s172_s28  }
   0x9   : > { %p11547_p5 = por %p183_p2, %p182_p0  ;;  %p11551_p6 = por %p189_p4, %p188_p3 }
   0xa   : > { %p10117_p7 = scmp.ge.s32.totalorder %s11467_s24, 1  ;;  %p245_p8 = scmp.lt.s32.totalorder %s11467_s24, 3 }
   0xc   : > { %p246_p9 = pnand %p10117_p7, %p245_p8 }
   0xd   : > { %v10123_v0 = vld [vmem:[%s12641_s4 + $0x4] sm:$0xf] (!%p246_p9)  ;;  %vm333_vm0 = vcmask (!%p246_p9), 1043456   ;;  %p290_p10 = scmp.lt.s32.totalorder (!%p246_p9), %s11530_s25, 1  ;;  %v11469_v1 = vmov (!%p246_p9), 0.0   ;;  %vm11470_vm1 = vmmov (!%p246_p9), 0  }
   0xe   : > { %249 = sbr.rel (%p246_p9) target bundleno = 510 (0x1fe), region = 44  ;;  %10721 = vmatprep.subr.mxu0 (!%p246_p9), %v11469_v1  ;;  %10726 = vmatprep.subr.mxu1 (!%p246_p9), %v11469_v1  ;;  %vm329_vm2 = vcmask (!%p246_p9), 31744   ;;  %v318_v10 = vld [vmem:[%s12641_s4] sm:$0xf] (!%p246_p9)  ;;  %v10156_v19 = vld [vmem:[%s12641_s4 + $0x8] sm:$0xf] (!%p246_p9) }
   0xf   : > { %10722 = vmatpush3.msk.msra.mxu0 (!%p246_p9), %vm333_vm0, %v10123_v0  ;;  %10727 = vmatpush3.msk.msra.mxu1 (!%p246_p9), %vm333_vm0, %v10123_v0  ;;  %v10173_v28 = vld [vmem:[%s12641_s4 + $0xc] sm:$0xf] (!%p246_p9)  ;;  %v10190_v37 = vld [vmem:[%s12641_s4 + $0x10] sm:$0xf] (!%p246_p9)  ;;  %v10207_v46 = vld [vmem:[%s12641_s4 + $0x14] sm:$0xf] (!%p246_p9) }
  0x10   : > { %10723 = vmatprep.mubr.msk.f32.mxu0 (!%p246_p9), %vm11470_vm1, %v11469_v1  ;;  %10728 = vmatprep.mubr.msk.f32.mxu1 (!%p246_p9), %vm11470_vm1, %v11469_v1  ;;  %v10224_v55 = vld [vmem:[%s12641_s4 + $0x18] sm:$0xf] (!%p246_p9)  ;;  %s10464_s26 = sshll.u32 (!%p246_p9), %s11530_s25, 10  ;;  %s11471_s10 = smov (!%p246_p9), [#allocation2]  }
  0x11   : > { %10731 = vmatprep.subr.mxu0 (!%p246_p9), %v11469_v1  ;;  %10736 = vmatprep.subr.mxu1 (!%p246_p9), %v11469_v1 }
  0x15   : > { %s291_s11 = scalar_select %p290_p10, %s11530_s25, 1 }
  0x17   : > { %s11572_s12 = smul.u32 144, %s291_s11  ;;  %s11409_s11 = sshll.u32 %s11471_s10, 4  ;;  %s11410_s11 = int_to_ptr.vmem [resolvable:$false] %s11409_s11 }
  0x18   : > { %s11411_s13 = scalar_lea.vmem %s11410_s11, 2048 }
  0x19   : > { %s11578_s15 = scalar_lea.vmem %s12638_s1, %s11572_s12  ;;  %s11642_s20 = scalar_lea.vmem %s12637_s0, %s11572_s12 }
  0x1a   : > { %v319_v2 = vld [vmem:[%s11578_s15] sm:$0xff]  ;;  %v11582_v3 = vld [vmem:[%s11578_s15 + $0x10] sm:$0xff]  ;;  %s11864_s16 = scalar_lea.vmem %s12639_s2, %s11572_s12  ;;  %s11942_s28 = scalar_lea.vmem %s12640_s3, %s11572_s12 }
  0x1b   : > { %10724 = vmatmul.mubr.msk.f32.vlgmr.msra.gmra.mrb[0].mxu0 %vm329_vm2, %v319_v2  ;;  %10729 = vmatmul.mubr.msk.f32.vlgmr.msra.gmra.mrb[0].mxu1 %vm329_vm2, %v11582_v3  ;;  %v11590_v4 = vld [vmem:[%s11578_s15 + $0x20] sm:$0xff]  ;;  %v11593_v5 = vld [vmem:[%s11578_s15 + $0x30] sm:$0xff] }
  0x1c   : > { %10732 = vmatpush3.msk.msra.mxu0 %vm333_vm0, %v10123_v0  ;;  %10737 = vmatpush3.msk.msra.mxu1 %vm333_vm0, %v10123_v0  ;;  %v11608_v6 = vld [vmem:[%s11578_s15 + $0x40] sm:$0xff]  ;;  %v11611_v7 = vld [vmem:[%s11578_s15 + $0x50] sm:$0xff] }
  0x1d   : > { %10733 = vmatprep.mubr.msk.f32.mxu0 %vm11470_vm1, %v11469_v1  ;;  %10738 = vmatprep.mubr.msk.f32.mxu1 %vm11470_vm1, %v11469_v1  ;;  %v11626_v8 = vld [vmem:[%s11578_s15 + $0x60] sm:$0xff]  ;;  %v11629_v9 = vld [vmem:[%s11578_s15 + $0x70] sm:$0xff] }
  0x1e   : > { %10741 = vmatprep.subr.mxu0 %v11469_v1  ;;  %10746 = vmatprep.subr.mxu1 %v11469_v1  ;;  %v310_v11 = vld [vmem:[%s11642_s20] sm:$0xff]  ;;  %v11654_v12 = vld [vmem:[%s11642_s20 + $0x10] sm:$0xff] }
  0x1f   : > { %10734 = vmatmul.mubr.msk.f32.vlgmr.msra.gmra.mrb[2].mxu0 %vm329_vm2, %v11590_v4  ;;  %10739 = vmatmul.mubr.msk.f32.vlgmr.msra.gmra.mrb[2].mxu1 %vm329_vm2, %v11593_v5  ;;  %v11668_v13 = vld [vmem:[%s11642_s20 + $0x20] sm:$0xff]  ;;  %v11671_v14 = vld [vmem:[%s11642_s20 + $0x30] sm:$0xff] }
  0x20   : > { %10742 = vmatpush3.msk.msra.mxu0 %vm333_vm0, %v10123_v0  ;;  %10747 = vmatpush3.msk.msra.mxu1 %vm333_vm0, %v10123_v0  ;;  %v11686_v15 = vld [vmem:[%s11642_s20 + $0x40] sm:$0xff]  ;;  %v11689_v16 = vld [vmem:[%s11642_s20 + $0x50] sm:$0xff] }
  0x21   : > { %10743 = vmatprep.mubr.msk.f32.mxu0 %vm11470_vm1, %v11469_v1  ;;  %10748 = vmatprep.mubr.msk.f32.mxu1 %vm11470_vm1, %v11469_v1  ;;  %v11704_v17 = vld [vmem:[%s11642_s20 + $0x60] sm:$0xff]  ;;  %v11707_v18 = vld [vmem:[%s11642_s20 + $0x70] sm:$0xff] }
  0x22   : > { %10751 = vmatprep.subr.mxu0 %v11469_v1  ;;  %10756 = vmatprep.subr.mxu1 %v11469_v1  ;;  %v1505_v20 = vld [vmem:[%s11642_s20 + $0x1] sm:$0xff]  ;;  %v11726_v21 = vld [vmem:[%s11642_s20 + $0x11] sm:$0xff] }
  0x23   : > { %10744 = vmatmul.mubr.msk.f32.vlgmr.msra.gmra.mrb[4].mxu0 %vm329_vm2, %v11608_v6  ;;  %10749 = vmatmul.mubr.msk.f32.vlgmr.msra.gmra.mrb[4].mxu1 %vm329_vm2, %v11611_v7  ;;  %v11740_v22 = vld [vmem:[%s11642_s20 + $0x21] sm:$0xff]  ;;  %v11743_v23 = vld [vmem:[%s11642_s20 + $0x31] sm:$0xff] }
  0x24   : > { %10752 = vmatpush3.msk.msra.mxu0 %vm333_vm0, %v10123_v0  ;;  %10757 = vmatpush3.msk.msra.mxu1 %vm333_vm0, %v10123_v0  ;;  %v11758_v24 = vld [vmem:[%s11642_s20 + $0x41] sm:$0xff]  ;;  %v11761_v25 = vld [vmem:[%s11642_s20 + $0x51] sm:$0xff]  ;;  %v10241_v0 = vld [vmem:[%s12641_s4 + $0x1c] sm:$0xf] }
  0x25   : > { %10753 = vmatprep.mubr.msk.f32.mxu0 %vm11470_vm1, %v11469_v1  ;;  %10758 = vmatprep.mubr.msk.f32.mxu1 %vm11470_vm1, %v11469_v1  ;;  %v11776_v26 = vld [vmem:[%s11642_s20 + $0x61] sm:$0xff]  ;;  %v11779_v27 = vld [vmem:[%s11642_s20 + $0x71] sm:$0xff] }
  0x26   : > { %10761 = vmatprep.subr.mxu0 %v11469_v1  ;;  %10766 = vmatprep.subr.mxu1 %v11469_v1  ;;  %v2110_v29 = vld [vmem:[%s11578_s15 + $0x1] sm:$0xff]  ;;  %v11798_v30 = vld [vmem:[%s11578_s15 + $0x11] sm:$0xff] }
  0x27   : > { %10754 = vmatmul.mubr.msk.f32.vlgmr.msra.gmra.mrb[6].mxu0 %vm329_vm2, %v11626_v8  ;;  %10759 = vmatmul.mubr.msk.f32.vlgmr.msra.gmra.mrb[6].mxu1 %vm329_vm2, %v11629_v9  ;;  %v11812_v31 = vld [vmem:[%s11578_s15 + $0x21] sm:$0xff]  ;;  %v11815_v32 = vld [vmem:[%s11578_s15 + $0x31] sm:$0xff] }
  0x28   : > { %10762 = vmatpush3.msk.msra.mxu0 %vm333_vm0, %v318_v10  ;;  %10767 = vmatpush3.msk.msra.mxu1 %vm333_vm0, %v318_v10  ;;  %v11830_v33 = vld [vmem:[%s11578_s15 + $0x41] sm:$0xff]  ;;  %v11833_v34 = vld [vmem:[%s11578_s15 + $0x51] sm:$0xff] }
  0x29   : > { %10763 = vmatprep.mubr.msk.f32.mxu0 %vm11470_vm1, %v11469_v1  ;;  %10768 = vmatprep.mubr.msk.f32.mxu1 %vm11470_vm1, %v11469_v1  ;;  %v11848_v35 = vld [vmem:[%s11578_s15 + $0x61] sm:$0xff]  ;;  %v11851_v36 = vld [vmem:[%s11578_s15 + $0x71] sm:$0xff] }
  0x2a   : > { %10771 = vmatprep.subr.mxu0 %v11469_v1  ;;  %10776 = vmatprep.subr.mxu1 %v11469_v1  ;;  %v2715_v38 = vld [vmem:[%s11864_s16] sm:$0xff]  ;;  %v11876_v39 = vld [vmem:[%s11864_s16 + $0x10] sm:$0xff] }
  0x2b   : > { %10764 = vmatmul.mubr.msk.f32.vlgmr.msra.gmra.mrb[8].mxu0 %vm329_vm2, %v310_v11  ;;  %10769 = vmatmul.mubr.msk.f32.vlgmr.msra.gmra.mrb[8].mxu1 %vm329_vm2, %v11654_v12  ;;  %v11890_v40 = vld [vmem:[%s11864_s16 + $0x20] sm:$0xff]  ;;  %v11893_v41 = vld [vmem:[%s11864_s16 + $0x30] sm:$0xff] }
  0x2c   : > { %10772 = vmatpush3.msk.msra.mxu0 %vm333_vm0, %v318_v10  ;;  %10777 = vmatpush3.msk.msra.mxu1 %vm333_vm0, %v318_v10  ;;  %v11908_v42 = vld [vmem:[%s11864_s16 + $0x40] sm:$0xff]  ;;  %v11911_v43 = vld [vmem:[%s11864_s16 + $0x50] sm:$0xff] }
  0x2d   : > { %10773 = vmatprep.mubr.msk.f32.mxu0 %vm11470_vm1, %v11469_v1  ;;  %10778 = vmatprep.mubr.msk.f32.mxu1 %vm11470_vm1, %v11469_v1  ;;  %v11926_v44 = vld [vmem:[%s11864_s16 + $0x60] sm:$0xff]  ;;  %v11929_v45 = vld [vmem:[%s11864_s16 + $0x70] sm:$0xff] }
  0x2e   : > { %10781 = vmatprep.subr.mxu0 %v11469_v1  ;;  %10786 = vmatprep.subr.mxu1 %v11469_v1  ;;  %v3320_v47 = vld [vmem:[%s11942_s28] sm:$0xff]  ;;  %v11954_v48 = vld [vmem:[%s11942_s28 + $0x10] sm:$0xff] }
  0x2f   : > { %10774 = vmatmul.mubr.msk.f32.vlgmr.msra.gmra.mrb[10].mxu0 %vm329_vm2, %v11668_v13  ;;  %10779 = vmatmul.mubr.msk.f32.vlgmr.msra.gmra.mrb[10].mxu1 %vm329_vm2, %v11671_v14  ;;  %v11968_v49 = vld [vmem:[%s11942_s28 + $0x20] sm:$0xff]  ;;  %v11971_v50 = vld [vmem:[%s11942_s28 + $0x30] sm:$0xff] }
  0x30   : > { %10782 = vmatpush3.msk.msra.mxu0 %vm333_vm0, %v318_v10  ;;  %10787 = vmatpush3.msk.msra.mxu1 %vm333_vm0, %v318_v10  ;;  %v11986_v51 = vld [vmem:[%s11942_s28 + $0x40] sm:$0xff]  ;;  %v11989_v52 = vld [vmem:[%s11942_s28 + $0x50] sm:$0xff] }
  0x31   : > { %10783 = vmatprep.mubr.msk.f32.mxu0 %vm11470_vm1, %v11469_v1  ;;  %10788 = vmatprep.mubr.msk.f32.mxu1 %vm11470_vm1, %v11469_v1  ;;  %v12004_v53 = vld [vmem:[%s11942_s28 + $0x60] sm:$0xff]  ;;  %v12007_v54 = vld [vmem:[%s11942_s28 + $0x70] sm:$0xff] }
  0x32   : > { %10791 = vmatprep.subr.mxu0 %v11469_v1  ;;  %10796 = vmatprep.subr.mxu1 %v11469_v1  ;;  %v3925_v56 = vld [vmem:[%s11864_s16 + $0x1] sm:$0xff]  ;;  %v12026_v57 = vld [vmem:[%s11864_s16 + $0x11] sm:$0xff] }
  0x33   : > { %10784 = vmatmul.mubr.msk.f32.vlgmr.msra.gmra.mrb[12].mxu0 %vm329_vm2, %v11686_v15  ;;  %10789 = vmatmul.mubr.msk.f32.vlgmr.msra.gmra.mrb[12].mxu1 %vm329_vm2, %v11689_v16  ;;  %v12040_v58 = vld [vmem:[%s11864_s16 + $0x21] sm:$0xff]  ;;  %v12043_v59 = vld [vmem:[%s11864_s16 + $0x31] sm:$0xff] }
  0x34   : > { %10792 = vmatpush3.msk.msra.mxu0 %vm333_vm0, %v318_v10  ;;  %10797 = vmatpush3.msk.msra.mxu1 %vm333_vm0, %v318_v10  ;;  %v12058_v60 = vld [vmem:[%s11864_s16 + $0x41] sm:$0xff]  ;;  %v12061_v61 = vld [vmem:[%s11864_s16 + $0x51] sm:$0xff] }
  0x35   : > { %10793 = vmatprep.mubr.msk.f32.mxu0 %vm11470_vm1, %v11469_v1  ;;  %10798 = vmatprep.mubr.msk.f32.mxu1 %vm11470_vm1, %v11469_v1  ;;  %v12076_v62 = vld [vmem:[%s11864_s16 + $0x61] sm:$0xff]  ;;  %v12079_v63 = vld [vmem:[%s11864_s16 + $0x71] sm:$0xff] }
  0x36   : > { %10801 = vmatprep.subr.mxu0 %v11469_v1  ;;  %10806 = vmatprep.subr.mxu1 %v11469_v1  ;;  %v4530_v2 = vld [vmem:[%s11942_s28 + $0x1] sm:$0xff]  ;;  %v12098_v10 = vld [vmem:[%s11942_s28 + $0x11] sm:$0xff] }
  0x37   : > { %10794 = vmatmul.mubr.msk.f32.vlgmr.msra.gmra.mrb[14].mxu0 %vm329_vm2, %v11704_v17  ;;  %10799 = vmatmul.mubr.msk.f32.vlgmr.msra.gmra.mrb[14].mxu1 %vm329_vm2, %v11707_v18  ;;  %v12112_v11 = vld [vmem:[%s11942_s28 + $0x21] sm:$0xff] }
  0x38   : > { %10802 = vmatpush3.msk.msra.mxu0 %vm333_vm0, %v10156_v19  ;;  %10807 = vmatpush3.msk.msra.mxu1 %vm333_vm0, %v10156_v19 }
  0x39   : > { %10803 = vmatprep.mubr.msk.f32.mxu0 %vm11470_vm1, %v11469_v1  ;;  %10808 = vmatprep.mubr.msk.f32.mxu1 %vm11470_vm1, %v11469_v1 }
  0x3a   : > { %10811 = vmatprep.subr.mxu0 %v11469_v1  ;;  %10816 = vmatprep.subr.mxu1 %v11469_v1 }
  0x3b   : > { %10804 = vmatmul.mubr.msk.f32.vlgmr.msra.gmra.mrb[16].mxu0 %vm329_vm2, %v1505_v20  ;;  %10809 = vmatmul.mubr.msk.f32.vlgmr.msra.gmra.mrb[16].mxu1 %vm329_vm2, %v11726_v21  ;;  %v12130_v20 = vld [vmem:[%s11942_s28 + $0x41] sm:$0xff] }
  0x3c   : > { %10812 = vmatpush3.msk.msra.mxu0 %vm333_vm0, %v10156_v19  ;;  %10817 = vmatpush3.msk.msra.mxu1 %vm333_vm0, %v10156_v19 }
  0x3d   : > { %10813 = vmatprep.mubr.msk.f32.mxu0 %vm11470_vm1, %v11469_v1  ;;  %10818 = vmatprep.mubr.msk.f32.mxu1 %vm11470_vm1, %v11469_v1 }
  0x3e   : > { %10821 = vmatprep.subr.mxu0 %v11469_v1  ;;  %10826 = vmatprep.subr.mxu1 %v11469_v1 }
  0x3f   : > { %10814 = vmatmul.mubr.msk.f32.vlgmr.msra.gmra.mrb[18].mxu0 %vm329_vm2, %v11740_v22  ;;  %10819 = vmatmul.mubr.msk.f32.vlgmr.msra.gmra.mrb[18].mxu1 %vm329_vm2, %v11743_v23 }
  0x40   : > { %10822 = vmatpush3.msk.msra.mxu0 %vm333_vm0, %v10156_v19  ;;  %10827 = vmatpush3.msk.msra.mxu1 %vm333_vm0, %v10156_v19 }
  0x41   : > { %10823 = vmatprep.mubr.msk.f32.mxu0 %vm11470_vm1, %v11469_v1  ;;  %10828 = vmatprep.mubr.msk.f32.mxu1 %vm11470_vm1, %v11469_v1 }
  0x42   : > { %10831 = vmatprep.subr.mxu0 %v11469_v1  ;;  %10836 = vmatprep.subr.mxu1 %v11469_v1 }
  0x43   : > { %10824 = vmatmul.mubr.msk.f32.vlgmr.msra.gmra.mrb[20].mxu0 %vm329_vm2, %v11758_v24  ;;  %10829 = vmatmul.mubr.msk.f32.vlgmr.msra.gmra.mrb[20].mxu1 %vm329_vm2, %v11761_v25 }
  0x44   : > { %10832 = vmatpush3.msk.msra.mxu0 %vm333_vm0, %v10156_v19  ;;  %10837 = vmatpush3.msk.msra.mxu1 %vm333_vm0, %v10156_v19  ;;  %v12115_v19 = vld [vmem:[%s11942_s28 + $0x31] sm:$0xff] }
  0x45   : > { %10833 = vmatprep.mubr.msk.f32.mxu0 %vm11470_vm1, %v11469_v1  ;;  %10838 = vmatprep.mubr.msk.f32.mxu1 %vm11470_vm1, %v11469_v1 }
  0x46   : > { %10841 = vmatprep.subr.mxu0 %v11469_v1  ;;  %10846 = vmatprep.subr.mxu1 %v11469_v1 }
  0x47   : > { %10834 = vmatmul.mubr.msk.f32.vlgmr.msra.gmra.mrb[22].mxu0 %vm329_vm2, %v11776_v26  ;;  %10839 = vmatmul.mubr.msk.f32.vlgmr.msra.gmra.mrb[22].mxu1 %vm329_vm2, %v11779_v27 }
  0x48   : > { %10842 = vmatpush3.msk.msra.mxu0 %vm333_vm0, %v10173_v28  ;;  %10847 = vmatpush3.msk.msra.mxu1 %vm333_vm0, %v10173_v28 }
  0x49   : > { %10843 = vmatprep.mubr.msk.f32.mxu0 %vm11470_vm1, %v11469_v1  ;;  %10848 = vmatprep.mubr.msk.f32.mxu1 %vm11470_vm1, %v11469_v1 }
  0x4a   : > { %10851 = vmatprep.subr.mxu0 %v11469_v1  ;;  %10856 = vmatprep.subr.mxu1 %v11469_v1 }
  0x4b   : > { %10844 = vmatmul.mubr.msk.f32.vlgmr.msra.gmra.mrb[24].mxu0 %vm329_vm2, %v2110_v29  ;;  %10849 = vmatmul.mubr.msk.f32.vlgmr.msra.gmra.mrb[24].mxu1 %vm329_vm2, %v11798_v30  ;;  %v12148_v29 = vld [vmem:[%s11942_s28 + $0x61] sm:$0xff] }
  0x4c   : > { %10852 = vmatpush3.msk.msra.mxu0 %vm333_vm0, %v10173_v28  ;;  %10857 = vmatpush3.msk.msra.mxu1 %vm333_vm0, %v10173_v28 }
  0x4d   : > { %10853 = vmatprep.mubr.msk.f32.mxu0 %vm11470_vm1, %v11469_v1  ;;  %10858 = vmatprep.mubr.msk.f32.mxu1 %vm11470_vm1, %v11469_v1 }
  0x4e   : > { %10861 = vmatprep.subr.mxu0 %v11469_v1  ;;  %10866 = vmatprep.subr.mxu1 %v11469_v1 }
  0x4f   : > { %10854 = vmatmul.mubr.msk.f32.vlgmr.msra.gmra.mrb[26].mxu0 %vm329_vm2, %v11812_v31  ;;  %10859 = vmatmul.mubr.msk.f32.vlgmr.msra.gmra.mrb[26].mxu1 %vm329_vm2, %v11815_v32 }
  0x50   : > { %10862 = vmatpush3.msk.msra.mxu0 %vm333_vm0, %v10173_v28  ;;  %10867 = vmatpush3.msk.msra.mxu1 %vm333_vm0, %v10173_v28 }
  0x51   : > { %10863 = vmatprep.mubr.msk.f32.mxu0 %vm11470_vm1, %v11469_v1  ;;  %10868 = vmatprep.mubr.msk.f32.mxu1 %vm11470_vm1, %v11469_v1 }
  0x52   : > { %10871 = vmatprep.subr.mxu0 %v11469_v1  ;;  %10876 = vmatprep.subr.mxu1 %v11469_v1 }
  0x53   : > { %10864 = vmatmul.mubr.msk.f32.vlgmr.msra.gmra.mrb[28].mxu0 %vm329_vm2, %v11830_v33  ;;  %10869 = vmatmul.mubr.msk.f32.vlgmr.msra.gmra.mrb[28].mxu1 %vm329_vm2, %v11833_v34 }
  0x54   : > { %10872 = vmatpush3.msk.msra.mxu0 %vm333_vm0, %v10173_v28  ;;  %10877 = vmatpush3.msk.msra.mxu1 %vm333_vm0, %v10173_v28  ;;  %v12133_v28 = vld [vmem:[%s11942_s28 + $0x51] sm:$0xff] }
  0x55   : > { %10873 = vmatprep.mubr.msk.f32.mxu0 %vm11470_vm1, %v11469_v1  ;;  %10878 = vmatprep.mubr.msk.f32.mxu1 %vm11470_vm1, %v11469_v1 }
  0x56   : > { %10881 = vmatprep.subr.mxu0 %v11469_v1  ;;  %10886 = vmatprep.subr.mxu1 %v11469_v1 }
  0x57   : > { %10874 = vmatmul.mubr.msk.f32.vlgmr.msra.gmra.mrb[30].mxu0 %vm329_vm2, %v11848_v35  ;;  %10879 = vmatmul.mubr.msk.f32.vlgmr.msra.gmra.mrb[30].mxu1 %vm329_vm2, %v11851_v36 }
  0x58   : > { %10882 = vmatpush3.msk.msra.mxu0 %vm333_vm0, %v10190_v37  ;;  %10887 = vmatpush3.msk.msra.mxu1 %vm333_vm0, %v10190_v37 }
  0x59   : > { %10883 = vmatprep.mubr.msk.f32.mxu0 %vm11470_vm1, %v11469_v1  ;;  %10888 = vmatprep.mubr.msk.f32.mxu1 %vm11470_vm1, %v11469_v1 }
  0x5a   : > { %10891 = vmatprep.subr.mxu0 %v11469_v1  ;;  %10896 = vmatprep.subr.mxu1 %v11469_v1 }
  0x5b   : > { %10884 = vmatmul.mubr.msk.f32.vlgmr.msra.gmra.mrb[32].mxu0 %vm329_vm2, %v2715_v38  ;;  %10889 = vmatmul.mubr.msk.f32.vlgmr.msra.gmra.mrb[32].mxu1 %vm329_vm2, %v11876_v39  ;;  %v10266_v38 = vld [vmem:[%s12641_s4 + $0x20] sm:$0xf] }
  0x5c   : > { %10892 = vmatpush3.msk.msra.mxu0 %vm333_vm0, %v10190_v37  ;;  %10897 = vmatpush3.msk.msra.mxu1 %vm333_vm0, %v10190_v37 }
  0x5d   : > { %10893 = vmatprep.mubr.msk.f32.mxu0 %vm11470_vm1, %v11469_v1  ;;  %10898 = vmatprep.mubr.msk.f32.mxu1 %vm11470_vm1, %v11469_v1 }
  0x5e   : > { %10901 = vmatprep.subr.mxu0 %v11469_v1  ;;  %10906 = vmatprep.subr.mxu1 %v11469_v1 }
  0x5f   : > { %10894 = vmatmul.mubr.msk.f32.vlgmr.msra.gmra.mrb[34].mxu0 %vm329_vm2, %v11890_v40  ;;  %10899 = vmatmul.mubr.msk.f32.vlgmr.msra.gmra.mrb[34].mxu1 %vm329_vm2, %v11893_v41 }
  0x60   : > { %10902 = vmatpush3.msk.msra.mxu0 %vm333_vm0, %v10190_v37  ;;  %10907 = vmatpush3.msk.msra.mxu1 %vm333_vm0, %v10190_v37 }
  0x61   : > { %10903 = vmatprep.mubr.msk.f32.mxu0 %vm11470_vm1, %v11469_v1  ;;  %10908 = vmatprep.mubr.msk.f32.mxu1 %vm11470_vm1, %v11469_v1 }
  0x62   : > { %10911 = vmatprep.subr.mxu0 %v11469_v1  ;;  %10916 = vmatprep.subr.mxu1 %v11469_v1 }
  0x63   : > { %10904 = vmatmul.mubr.msk.f32.vlgmr.msra.gmra.mrb[36].mxu0 %vm329_vm2, %v11908_v42  ;;  %10909 = vmatmul.mubr.msk.f32.vlgmr.msra.gmra.mrb[36].mxu1 %vm329_vm2, %v11911_v43 }
  0x64   : > { %10912 = vmatpush3.msk.msra.mxu0 %vm333_vm0, %v10190_v37  ;;  %10917 = vmatpush3.msk.msra.mxu1 %vm333_vm0, %v10190_v37  ;;  %v12151_v37 = vld [vmem:[%s11942_s28 + $0x71] sm:$0xff] }
  0x65   : > { %10913 = vmatprep.mubr.msk.f32.mxu0 %vm11470_vm1, %v11469_v1  ;;  %10918 = vmatprep.mubr.msk.f32.mxu1 %vm11470_vm1, %v11469_v1 }
  0x66   : > { %10921 = vmatprep.subr.mxu0 %v11469_v1  ;;  %10926 = vmatprep.subr.mxu1 %v11469_v1 }
  0x67   : > { %10914 = vmatmul.mubr.msk.f32.vlgmr.msra.gmra.mrb[38].mxu0 %vm329_vm2, %v11926_v44  ;;  %10919 = vmatmul.mubr.msk.f32.vlgmr.msra.gmra.mrb[38].mxu1 %vm329_vm2, %v11929_v45 }
  0x68   : > { %10922 = vmatpush3.msk.msra.mxu0 %vm333_vm0, %v10207_v46  ;;  %10927 = vmatpush3.msk.msra.mxu1 %vm333_vm0, %v10207_v46 }
  0x69   : > { %10923 = vmatprep.mubr.msk.f32.mxu0 %vm11470_vm1, %v11469_v1  ;;  %10928 = vmatprep.mubr.msk.f32.mxu1 %vm11470_vm1, %v11469_v1 }
  0x6a   : > { %10931 = vmatprep.subr.mxu0 %v11469_v1  ;;  %10936 = vmatprep.subr.mxu1 %v11469_v1 }
  0x6b   : > { %10924 = vmatmul.mubr.msk.f32.vlgmr.msra.gmra.mrb[40].mxu0 %vm329_vm2, %v3320_v47  ;;  %10929 = vmatmul.mubr.msk.f32.vlgmr.msra.gmra.mrb[40].mxu1 %vm329_vm2, %v11954_v48 }
  0x6c   : > { %10932 = vmatpush3.msk.msra.mxu0 %vm333_vm0, %v10207_v46  ;;  %10937 = vmatpush3.msk.msra.mxu1 %vm333_vm0, %v10207_v46 }
  0x6d   : > { %10933 = vmatprep.mubr.msk.f32.mxu0 %vm11470_vm1, %v11469_v1  ;;  %10938 = vmatprep.mubr.msk.f32.mxu1 %vm11470_vm1, %v11469_v1 }
  0x6e   : > { %10941 = vmatprep.subr.mxu0 %v11469_v1  ;;  %10946 = vmatprep.subr.mxu1 %v11469_v1 }
  0x6f   : > { %10934 = vmatmul.mubr.msk.f32.vlgmr.msra.gmra.mrb[42].mxu0 %vm329_vm2, %v11968_v49  ;;  %10939 = vmatmul.mubr.msk.f32.vlgmr.msra.gmra.mrb[42].mxu1 %vm329_vm2, %v11971_v50 }
  0x70   : > { %10942 = vmatpush3.msk.msra.mxu0 %vm333_vm0, %v10207_v46  ;;  %10947 = vmatpush3.msk.msra.mxu1 %vm333_vm0, %v10207_v46 }
  0x71   : > { %10943 = vmatprep.mubr.msk.f32.mxu0 %vm11470_vm1, %v11469_v1  ;;  %10948 = vmatprep.mubr.msk.f32.mxu1 %vm11470_vm1, %v11469_v1 }
  0x72   : > { %10951 = vmatprep.subr.mxu0 %v11469_v1  ;;  %10956 = vmatprep.subr.mxu1 %v11469_v1 }
  0x73   : > { %10944 = vmatmul.mubr.msk.f32.vlgmr.msra.gmra.mrb[44].mxu0 %vm329_vm2, %v11986_v51  ;;  %10949 = vmatmul.mubr.msk.f32.vlgmr.msra.gmra.mrb[44].mxu1 %vm329_vm2, %v11989_v52 }
  0x74   : > { %10952 = vmatpush3.msk.msra.mxu0 %vm333_vm0, %v10207_v46  ;;  %10957 = vmatpush3.msk.msra.mxu1 %vm333_vm0, %v10207_v46 }
  0x75   : > { %10953 = vmatprep.mubr.msk.f32.mxu0 %vm11470_vm1, %v11469_v1  ;;  %10958 = vmatprep.mubr.msk.f32.mxu1 %vm11470_vm1, %v11469_v1 }
  0x76   : > { %10961 = vmatprep.subr.mxu0 %v11469_v1  ;;  %10966 = vmatprep.subr.mxu1 %v11469_v1 }
  0x77   : > { %10954 = vmatmul.mubr.msk.f32.vlgmr.msra.gmra.mrb[46].mxu0 %vm329_vm2, %v12004_v53  ;;  %10959 = vmatmul.mubr.msk.f32.vlgmr.msra.gmra.mrb[46].mxu1 %vm329_vm2, %v12007_v54 }
  0x78   : > { %10962 = vmatpush3.msk.msra.mxu0 %vm333_vm0, %v10224_v55  ;;  %10967 = vmatpush3.msk.msra.mxu1 %vm333_vm0, %v10224_v55 }
  0x79   : > { %10963 = vmatprep.mubr.msk.f32.mxu0 %vm11470_vm1, %v11469_v1  ;;  %10968 = vmatprep.mubr.msk.f32.mxu1 %vm11470_vm1, %v11469_v1 }
  0x7a   : > { %10971 = vmatprep.subr.mxu0 %v11469_v1  ;;  %10976 = vmatprep.subr.mxu1 %v11469_v1 }
  0x7b   : > { %10964 = vmatmul.mubr.msk.f32.vlgmr.msra.gmra.mrb[48].mxu0 %vm329_vm2, %v3925_v56  ;;  %10969 = vmatmul.mubr.msk.f32.vlgmr.msra.gmra.mrb[48].mxu1 %vm329_vm2, %v12026_v57 }
  0x7c   : > { %10972 = vmatpush3.msk.msra.mxu0 %vm333_vm0, %v10224_v55  ;;  %10977 = vmatpush3.msk.msra.mxu1 %vm333_vm0, %v10224_v55 }
  0x7d   : > { %10973 = vmatprep.mubr.msk.f32.mxu0 %vm11470_vm1, %v11469_v1  ;;  %10978 = vmatprep.mubr.msk.f32.mxu1 %vm11470_vm1, %v11469_v1 }
  0x7e   : > { %10981 = vmatprep.subr.mxu0 %v11469_v1  ;;  %10986 = vmatprep.subr.mxu1 %v11469_v1 }
  0x7f   : > { %10974 = vmatmul.mubr.msk.f32.vlgmr.msra.gmra.mrb[50].mxu0 %vm329_vm2, %v12040_v58  ;;  %10979 = vmatmul.mubr.msk.f32.vlgmr.msra.gmra.mrb[50].mxu1 %vm329_vm2, %v12043_v59 }
  0x80   : > { %10982 = vmatpush3.msk.msra.mxu0 %vm333_vm0, %v10224_v55  ;;  %10987 = vmatpush3.msk.msra.mxu1 %vm333_vm0, %v10224_v55 }
  0x81   : > { %10983 = vmatprep.mubr.msk.f32.mxu0 %vm11470_vm1, %v11469_v1  ;;  %10988 = vmatprep.mubr.msk.f32.mxu1 %vm11470_vm1, %v11469_v1 }
  0x82   : > { %10991 = vmatprep.subr.mxu0 %v11469_v1  ;;  %10996 = vmatprep.subr.mxu1 %v11469_v1 }
  0x83   : > { %10984 = vmatmul.mubr.msk.f32.vlgmr.msra.gmra.mrb[52].mxu0 %vm329_vm2, %v12058_v60  ;;  %10989 = vmatmul.mubr.msk.f32.vlgmr.msra.gmra.mrb[52].mxu1 %vm329_vm2, %v12061_v61 }
  0x84   : > { %10992 = vmatpush3.msk.msra.mxu0 %vm333_vm0, %v10224_v55  ;;  %10997 = vmatpush3.msk.msra.mxu1 %vm333_vm0, %v10224_v55 }
  0x85   : > { %10993 = vmatprep.mubr.msk.f32.mxu0 %vm11470_vm1, %v11469_v1  ;;  %10998 = vmatprep.mubr.msk.f32.mxu1 %vm11470_vm1, %v11469_v1 }
  0x86   : > { %11001 = vmatprep.subr.mxu0 %v11469_v1  ;;  %11006 = vmatprep.subr.mxu1 %v11469_v1 }
  0x87   : > { %10994 = vmatmul.mubr.msk.f32.vlgmr.msra.gmra.mrb[54].mxu0 %vm329_vm2, %v12076_v62  ;;  %10999 = vmatmul.mubr.msk.f32.vlgmr.msra.gmra.mrb[54].mxu1 %vm329_vm2, %v12079_v63 }
  0x88   : > { %11002 = vmatpush3.msk.msra.mxu0 %vm333_vm0, %v10241_v0  ;;  %11007 = vmatpush3.msk.msra.mxu1 %vm333_vm0, %v10241_v0 }
  0x89   : > { %11003 = vmatprep.mubr.msk.f32.mxu0 %vm11470_vm1, %v11469_v1  ;;  %11008 = vmatprep.mubr.msk.f32.mxu1 %vm11470_vm1, %v11469_v1 }
  0x8a   : > { %11011 = vmatprep.subr.mxu0 %v11469_v1  ;;  %11016 = vmatprep.subr.mxu1 %v11469_v1 }
  0x8b   : > { %11004 = vmatmul.mubr.msk.f32.vlgmr.msra.gmra.mrb[56].mxu0 %vm329_vm2, %v4530_v2  ;;  %11009 = vmatmul.mubr.msk.f32.vlgmr.msra.gmra.mrb[56].mxu1 %vm329_vm2, %v12098_v10 }
  0x8c   : > { %11012 = vmatpush3.msk.msra.mxu0 %vm333_vm0, %v10241_v0  ;;  %11017 = vmatpush3.msk.msra.mxu1 %vm333_vm0, %v10241_v0 }
  0x8d   : > { %11013 = vmatprep.mubr.msk.f32.mxu0 %vm11470_vm1, %v11469_v1  ;;  %11018 = vmatprep.mubr.msk.f32.mxu1 %vm11470_vm1, %v11469_v1 }
  0x8e   : > { %11021 = vmatprep.subr.mxu0 %v11469_v1  ;;  %11026 = vmatprep.subr.mxu1 %v11469_v1 }
  0x8f   : > { %11014 = vmatmul.mubr.msk.f32.vlgmr.msra.gmra.mrb[58].mxu0 %vm329_vm2, %v12112_v11  ;;  %11019 = vmatmul.mubr.msk.f32.vlgmr.msra.gmra.mrb[58].mxu1 %vm329_vm2, %v12115_v19 }
  0x90   : > { %11022 = vmatpush3.msk.msra.mxu0 %vm333_vm0, %v10241_v0  ;;  %11027 = vmatpush3.msk.msra.mxu1 %vm333_vm0, %v10241_v0 }
  0x91   : > { %11023 = vmatprep.mubr.msk.f32.mxu0 %vm11470_vm1, %v11469_v1  ;;  %11028 = vmatprep.mubr.msk.f32.mxu1 %vm11470_vm1, %v11469_v1 }
  0x92   : > { %11031 = vmatprep.subr.mxu0 %v11469_v1  ;;  %11036 = vmatprep.subr.mxu1 %v11469_v1 }
  0x93   : > { %11024 = vmatmul.mubr.msk.f32.vlgmr.msra.gmra.mrb[60].mxu0 %vm329_vm2, %v12130_v20  ;;  %11029 = vmatmul.mubr.msk.f32.vlgmr.msra.gmra.mrb[60].mxu1 %vm329_vm2, %v12133_v28 }
  0x94   : > { %11032 = vmatpush3.msk.msra.mxu0 %vm333_vm0, %v10241_v0  ;;  %11037 = vmatpush3.msk.msra.mxu1 %vm333_vm0, %v10241_v0 }
  0x95   : > { %11033 = vmatprep.mubr.msk.f32.mxu0 %vm11470_vm1, %v11469_v1  ;;  %11038 = vmatprep.mubr.msk.f32.mxu1 %vm11470_vm1, %v11469_v1 }
  0x96   : > { %11041 = vmatprep.subr.mxu0 %v11469_v1  ;;  %11046 = vmatprep.subr.mxu1 %v11469_v1 }
  0x97   : > { %11034 = vmatmul.mubr.msk.f32.vlgmr.msra.gmra.mrb[62].mxu0 %vm329_vm2, %v12148_v29  ;;  %11039 = vmatmul.mubr.msk.f32.vlgmr.msra.gmra.mrb[62].mxu1 %vm329_vm2, %v12151_v37 }
  0x98   : > { %11042 = vmatpush3.msk.msra.mxu0 %vm333_vm0, %v10266_v38  ;;  %11047 = vmatpush3.msk.msra.mxu1 %vm333_vm0, %v10266_v38 }
  0x99   : > { %11043 = vmatprep.mubr.msk.f32.mxu0 %vm11470_vm1, %v11469_v1  ;;  %11048 = vmatprep.mubr.msk.f32.mxu1 %vm11470_vm1, %v11469_v1 }
  0x9a   : > { %11051 = vmatprep.subr.mxu0 %v11469_v1  ;;  %11056 = vmatprep.subr.mxu1 %v11469_v1 }
  0x9b   : > { %11044 = vmatmul.mubr.msk.f32.vlgmr.msra.gmra.mrb[64].mxu0 %vm329_vm2, %v11654_v12  ;;  %11049 = vmatmul.mubr.msk.f32.vlgmr.msra.gmra.mrb[64].mxu1 %vm329_vm2, %v11668_v13  ;;  %v10265_v12 = vld [vmem:[%s11642_s20 + $0x80] sm:$0xff] }
  0x9c   : > { %11052 = vmatpush3.msk.msra.mxu0 %vm333_vm0, %v10266_v38  ;;  %11057 = vmatpush3.msk.msra.mxu1 %vm333_vm0, %v10266_v38  ;;  %v10291_v13 = vld [vmem:[%s12641_s4 + $0x24] sm:$0xf] }
  0x9d   : > { %11053 = vmatprep.mubr.msk.f32.mxu0 %vm11470_vm1, %v11469_v1  ;;  %11058 = vmatprep.mubr.msk.f32.mxu1 %vm11470_vm1, %v11469_v1 }
  0x9e   : > { %11061 = vmatprep.subr.mxu0 %v11469_v1  ;;  %11066 = vmatprep.subr.mxu1 %v11469_v1 }
  0x9f   : > { %11054 = vmatmul.mubr.msk.f32.vlgmr.msra.gmra.mrb[66].mxu0 %vm329_vm2, %v11671_v14  ;;  %11059 = vmatmul.mubr.msk.f32.vlgmr.msra.gmra.mrb[66].mxu1 %vm329_vm2, %v11686_v15  ;;  %v10391_v14 = vld [vmem:[%s12641_s4 + $0x34] sm:$0xf] }
  0xa0   : > { %11062 = vmatpush3.msk.msra.mxu0 %vm333_vm0, %v10266_v38  ;;  %11067 = vmatpush3.msk.msra.mxu1 %vm333_vm0, %v10266_v38 }
  0xa1   : > { %11063 = vmatprep.mubr.msk.f32.mxu0 %vm11470_vm1, %v11469_v1  ;;  %11068 = vmatprep.mubr.msk.f32.mxu1 %vm11470_vm1, %v11469_v1 }
  0xa2   : > { %11071 = vmatprep.subr.mxu0 %v11469_v1  ;;  %11076 = vmatprep.subr.mxu1 %v11469_v1 }
  0xa3   : > { %11064 = vmatmul.mubr.msk.f32.vlgmr.msra.gmra.mrb[68].mxu0 %vm329_vm2, %v11689_v16  ;;  %11069 = vmatmul.mubr.msk.f32.vlgmr.msra.gmra.mrb[68].mxu1 %vm329_vm2, %v11704_v17 }
  0xa4   : > { %11072 = vmatpush3.msk.msra.mxu0 %vm333_vm0, %v10266_v38  ;;  %11077 = vmatpush3.msk.msra.mxu1 %vm333_vm0, %v10266_v38 }
  0xa5   : > { %11073 = vmatprep.mubr.msk.f32.mxu0 %vm11470_vm1, %v11469_v1  ;;  %11078 = vmatprep.mubr.msk.f32.mxu1 %vm11470_vm1, %v11469_v1 }
  0xa6   : > { %11081 = vmatprep.subr.mxu0 %v11469_v1  ;;  %11086 = vmatprep.subr.mxu1 %v11469_v1 }
  0xa7   : > { %11074 = vmatmul.mubr.msk.f32.vlgmr.msra.gmra.mrb[70].mxu0 %vm329_vm2, %v11707_v18  ;;  %11079 = vmatmul.mubr.msk.f32.vlgmr.msra.gmra.mrb[70].mxu1 %vm329_vm2, %v10265_v12 }
  0xa8   : > { %11082 = vmatpush3.msk.msra.mxu0 %vm333_vm0, %v10291_v13  ;;  %11087 = vmatpush3.msk.msra.mxu1 %vm333_vm0, %v10291_v13 }
  0xa9   : > { %11083 = vmatprep.mubr.msk.f32.mxu0 %vm11470_vm1, %v11469_v1  ;;  %11088 = vmatprep.mubr.msk.f32.mxu1 %vm11470_vm1, %v11469_v1 }
  0xaa   : > { %11091 = vmatprep.subr.mxu0 %v11469_v1  ;;  %11096 = vmatprep.subr.mxu1 %v11469_v1 }
  0xab   : > { %11084 = vmatmul.mubr.msk.f32.vlgmr.msra.gmra.mrb[72].mxu0 %vm329_vm2, %v11582_v3  ;;  %11089 = vmatmul.mubr.msk.f32.vlgmr.msra.gmra.mrb[72].mxu1 %vm329_vm2, %v11590_v4  ;;  %v10290_v3 = vld [vmem:[%s11578_s15 + $0x80] sm:$0xff]  ;;  %v10316_v4 = vld [vmem:[%s12641_s4 + $0x28] sm:$0xf] }
  0xac   : > { %11092 = vmatpush3.msk.msra.mxu0 %vm333_vm0, %v10291_v13  ;;  %11097 = vmatpush3.msk.msra.mxu1 %vm333_vm0, %v10291_v13 }
  0xad   : > { %11093 = vmatprep.mubr.msk.f32.mxu0 %vm11470_vm1, %v11469_v1  ;;  %11098 = vmatprep.mubr.msk.f32.mxu1 %vm11470_vm1, %v11469_v1 }
  0xae   : > { %11101 = vmatprep.subr.mxu0 %v11469_v1  ;;  %11106 = vmatprep.subr.mxu1 %v11469_v1 }
  0xaf   : > { %11094 = vmatmul.mubr.msk.f32.vlgmr.msra.gmra.mrb[74].mxu0 %vm329_vm2, %v11593_v5  ;;  %11099 = vmatmul.mubr.msk.f32.vlgmr.msra.gmra.mrb[74].mxu1 %vm329_vm2, %v11608_v6  ;;  %v10315_v5 = vld [vmem:[%s11642_s20 + $0x81] sm:$0xff]  ;;  %v10341_v6 = vld [vmem:[%s12641_s4 + $0x2c] sm:$0xf] }
  0xb0   : > { %11102 = vmatpush3.msk.msra.mxu0 %vm333_vm0, %v10291_v13  ;;  %11107 = vmatpush3.msk.msra.mxu1 %vm333_vm0, %v10291_v13 }
  0xb1   : > { %11103 = vmatprep.mubr.msk.f32.mxu0 %vm11470_vm1, %v11469_v1  ;;  %11108 = vmatprep.mubr.msk.f32.mxu1 %vm11470_vm1, %v11469_v1 }
  0xb2   : > { %11111 = vmatprep.subr.mxu0 %v11469_v1  ;;  %11116 = vmatprep.subr.mxu1 %v11469_v1 }
  0xb3   : > { %11104 = vmatmul.mubr.msk.f32.vlgmr.msra.gmra.mrb[76].mxu0 %vm329_vm2, %v11611_v7  ;;  %11109 = vmatmul.mubr.msk.f32.vlgmr.msra.gmra.mrb[76].mxu1 %vm329_vm2, %v11626_v8  ;;  %v10340_v7 = vld [vmem:[%s11578_s15 + $0x81] sm:$0xff]  ;;  %v10366_v8 = vld [vmem:[%s12641_s4 + $0x30] sm:$0xf]  ;;  %s12588_s15 = scalar_lea.hbm %s12643_s6, %s10464_s26 }
  0xb4   : > { %11112 = vmatpush3.msk.msra.mxu0 %vm333_vm0, %v10291_v13  ;;  %11117 = vmatpush3.msk.msra.mxu1 %vm333_vm0, %v10291_v13 }
  0xb5   : > { %11113 = vmatprep.mubr.msk.f32.mxu0 %vm11470_vm1, %v11469_v1  ;;  %11118 = vmatprep.mubr.msk.f32.mxu1 %vm11470_vm1, %v11469_v1 }
  0xb6   : > { %11121 = vmatprep.subr.mxu0 %v11469_v1  ;;  %11126 = vmatprep.subr.mxu1 %v11469_v1 }
  0xb7   : > { %11114 = vmatmul.mubr.msk.f32.vlgmr.msra.gmra.mrb[78].mxu0 %vm329_vm2, %v11629_v9  ;;  %11119 = vmatmul.mubr.msk.f32.vlgmr.msra.gmra.mrb[78].mxu1 %vm329_vm2, %v10290_v3  ;;  %v10365_v9 = vld [vmem:[%s11864_s16 + $0x80] sm:$0xff] }
  0xb8   : > { %11122 = vmatpush3.msk.msra.mxu0 %vm333_vm0, %v10316_v4  ;;  %11127 = vmatpush3.msk.msra.mxu1 %vm333_vm0, %v10316_v4 }
  0xb9   : > { %11123 = vmatprep.mubr.msk.f32.mxu0 %vm11470_vm1, %v11469_v1  ;;  %11128 = vmatprep.mubr.msk.f32.mxu1 %vm11470_vm1, %v11469_v1 }
  0xba   : > { %11131 = vmatprep.subr.mxu0 %v11469_v1  ;;  %11136 = vmatprep.subr.mxu1 %v11469_v1 }
  0xbb   : > { %11124 = vmatmul.mubr.msk.f32.vlgmr.msra.gmra.mrb[80].mxu0 %vm329_vm2, %v11726_v21  ;;  %11129 = vmatmul.mubr.msk.f32.vlgmr.msra.gmra.mrb[80].mxu1 %vm329_vm2, %v11740_v22 }
  0xbc   : > { %11132 = vmatpush3.msk.msra.mxu0 %vm333_vm0, %v10316_v4  ;;  %11137 = vmatpush3.msk.msra.mxu1 %vm333_vm0, %v10316_v4 }
  0xbd   : > { %11133 = vmatprep.mubr.msk.f32.mxu0 %vm11470_vm1, %v11469_v1  ;;  %11138 = vmatprep.mubr.msk.f32.mxu1 %vm11470_vm1, %v11469_v1 }
  0xbe   : > { %11141 = vmatprep.subr.mxu0 %v11469_v1  ;;  %11146 = vmatprep.subr.mxu1 %v11469_v1 }
  0xbf   : > { %11134 = vmatmul.mubr.msk.f32.vlgmr.msra.gmra.mrb[82].mxu0 %vm329_vm2, %v11743_v23  ;;  %11139 = vmatmul.mubr.msk.f32.vlgmr.msra.gmra.mrb[82].mxu1 %vm329_vm2, %v11758_v24 }
  0xc0   : > { %11142 = vmatpush3.msk.msra.mxu0 %vm333_vm0, %v10316_v4  ;;  %11147 = vmatpush3.msk.msra.mxu1 %vm333_vm0, %v10316_v4 }
  0xc1   : > { %11143 = vmatprep.mubr.msk.f32.mxu0 %vm11470_vm1, %v11469_v1  ;;  %11148 = vmatprep.mubr.msk.f32.mxu1 %vm11470_vm1, %v11469_v1 }
  0xc2   : > { %11151 = vmatprep.subr.mxu0 %v11469_v1  ;;  %11156 = vmatprep.subr.mxu1 %v11469_v1 }
  0xc3   : > { %11144 = vmatmul.mubr.msk.f32.vlgmr.msra.gmra.mrb[84].mxu0 %vm329_vm2, %v11761_v25  ;;  %11149 = vmatmul.mubr.msk.f32.vlgmr.msra.gmra.mrb[84].mxu1 %vm329_vm2, %v11776_v26  ;;  %v10390_v25 = vld [vmem:[%s11942_s28 + $0x80] sm:$0xff]  ;;  %v10416_v26 = vld [vmem:[%s12641_s4 + $0x38] sm:$0xf] }
  0xc4   : > { %11152 = vmatpush3.msk.msra.mxu0 %vm333_vm0, %v10316_v4  ;;  %11157 = vmatpush3.msk.msra.mxu1 %vm333_vm0, %v10316_v4 }
  0xc5   : > { %11153 = vmatprep.mubr.msk.f32.mxu0 %vm11470_vm1, %v11469_v1  ;;  %11158 = vmatprep.mubr.msk.f32.mxu1 %vm11470_vm1, %v11469_v1 }
  0xc6   : > { %11161 = vmatprep.subr.mxu0 %v11469_v1  ;;  %11166 = vmatprep.subr.mxu1 %v11469_v1 }
  0xc7   : > { %11154 = vmatmul.mubr.msk.f32.vlgmr.msra.gmra.mrb[86].mxu0 %vm329_vm2, %v11779_v27  ;;  %11159 = vmatmul.mubr.msk.f32.vlgmr.msra.gmra.mrb[86].mxu1 %vm329_vm2, %v10315_v5 }
  0xc8   : > { %11162 = vmatpush3.msk.msra.mxu0 %vm333_vm0, %v10341_v6  ;;  %11167 = vmatpush3.msk.msra.mxu1 %vm333_vm0, %v10341_v6 }
  0xc9   : > { %11163 = vmatprep.mubr.msk.f32.mxu0 %vm11470_vm1, %v11469_v1  ;;  %11168 = vmatprep.mubr.msk.f32.mxu1 %vm11470_vm1, %v11469_v1 }
  0xca   : > { %11171 = vmatprep.subr.mxu0 %v11469_v1  ;;  %11176 = vmatprep.subr.mxu1 %v11469_v1 }
  0xcb   : > { %11164 = vmatmul.mubr.msk.f32.vlgmr.msra.gmra.mrb[88].mxu0 %vm329_vm2, %v11798_v30  ;;  %11169 = vmatmul.mubr.msk.f32.vlgmr.msra.gmra.mrb[88].mxu1 %vm329_vm2, %v11812_v31 }
  0xcc   : > { %11172 = vmatpush3.msk.msra.mxu0 %vm333_vm0, %v10341_v6  ;;  %11177 = vmatpush3.msk.msra.mxu1 %vm333_vm0, %v10341_v6 }
  0xcd   : > { %11173 = vmatprep.mubr.msk.f32.mxu0 %vm11470_vm1, %v11469_v1  ;;  %11178 = vmatprep.mubr.msk.f32.mxu1 %vm11470_vm1, %v11469_v1 }
  0xce   : > { %11181 = vmatprep.subr.mxu0 %v11469_v1  ;;  %11186 = vmatprep.subr.mxu1 %v11469_v1 }
  0xcf   : > { %11174 = vmatmul.mubr.msk.f32.vlgmr.msra.gmra.mrb[90].mxu0 %vm329_vm2, %v11815_v32  ;;  %11179 = vmatmul.mubr.msk.f32.vlgmr.msra.gmra.mrb[90].mxu1 %vm329_vm2, %v11830_v33 }
  0xd0   : > { %11182 = vmatpush3.msk.msra.mxu0 %vm333_vm0, %v10341_v6  ;;  %11187 = vmatpush3.msk.msra.mxu1 %vm333_vm0, %v10341_v6 }
  0xd1   : > { %11183 = vmatprep.mubr.msk.f32.mxu0 %vm11470_vm1, %v11469_v1  ;;  %11188 = vmatprep.mubr.msk.f32.mxu1 %vm11470_vm1, %v11469_v1 }
  0xd2   : > { %11191 = vmatprep.subr.mxu0 %v11469_v1  ;;  %11196 = vmatprep.subr.mxu1 %v11469_v1 }
  0xd3   : > { %11184 = vmatmul.mubr.msk.f32.vlgmr.msra.gmra.mrb[92].mxu0 %vm329_vm2, %v11833_v34  ;;  %11189 = vmatmul.mubr.msk.f32.vlgmr.msra.gmra.mrb[92].mxu1 %vm329_vm2, %v11848_v35 }
  0xd4   : > { %11192 = vmatpush3.msk.msra.mxu0 %vm333_vm0, %v10341_v6  ;;  %11197 = vmatpush3.msk.msra.mxu1 %vm333_vm0, %v10341_v6 }
  0xd5   : > { %11193 = vmatprep.mubr.msk.f32.mxu0 %vm11470_vm1, %v11469_v1  ;;  %11198 = vmatprep.mubr.msk.f32.mxu1 %vm11470_vm1, %v11469_v1 }
  0xd6   : > { %11201 = vmatprep.subr.mxu0 %v11469_v1  ;;  %11206 = vmatprep.subr.mxu1 %v11469_v1 }
  0xd7   : > { %11194 = vmatmul.mubr.msk.f32.vlgmr.msra.gmra.mrb[94].mxu0 %vm329_vm2, %v11851_v36  ;;  %11199 = vmatmul.mubr.msk.f32.vlgmr.msra.gmra.mrb[94].mxu1 %vm329_vm2, %v10340_v7  ;;  %v10440_v7 = vld [vmem:[%s11942_s28 + $0x81] sm:$0xff] }
  0xd8   : > { %11202 = vmatpush3.msk.msra.mxu0 %vm333_vm0, %v10366_v8  ;;  %11207 = vmatpush3.msk.msra.mxu1 %vm333_vm0, %v10366_v8 }
  0xd9   : > { %11203 = vmatprep.mubr.msk.f32.mxu0 %vm11470_vm1, %v11469_v1  ;;  %11208 = vmatprep.mubr.msk.f32.mxu1 %vm11470_vm1, %v11469_v1 }
  0xda   : > { %11211 = vmatprep.subr.mxu0 %v11469_v1  ;;  %11216 = vmatprep.subr.mxu1 %v11469_v1 }
  0xdb   : > { %11204 = vmatmul.mubr.msk.f32.vlgmr.msra.gmra.mrb[96].mxu0 %vm329_vm2, %v11876_v39  ;;  %11209 = vmatmul.mubr.msk.f32.vlgmr.msra.gmra.mrb[96].mxu1 %vm329_vm2, %v11890_v40 }
  0xdc   : > { %11212 = vmatpush3.msk.msra.mxu0 %vm333_vm0, %v10366_v8  ;;  %11217 = vmatpush3.msk.msra.mxu1 %vm333_vm0, %v10366_v8 }
  0xdd   : > { %11213 = vmatprep.mubr.msk.f32.mxu0 %vm11470_vm1, %v11469_v1  ;;  %11218 = vmatprep.mubr.msk.f32.mxu1 %vm11470_vm1, %v11469_v1 }
  0xde   : > { %11221 = vmatprep.subr.mxu0 %v11469_v1  ;;  %11226 = vmatprep.subr.mxu1 %v11469_v1 }
  0xdf   : > { %11214 = vmatmul.mubr.msk.f32.vlgmr.msra.gmra.mrb[98].mxu0 %vm329_vm2, %v11893_v41  ;;  %11219 = vmatmul.mubr.msk.f32.vlgmr.msra.gmra.mrb[98].mxu1 %vm329_vm2, %v11908_v42 }
  0xe0   : > { %11222 = vmatpush3.msk.msra.mxu0 %vm333_vm0, %v10366_v8  ;;  %11227 = vmatpush3.msk.msra.mxu1 %vm333_vm0, %v10366_v8 }
  0xe1   : > { %11223 = vmatprep.mubr.msk.f32.mxu0 %vm11470_vm1, %v11469_v1  ;;  %11228 = vmatprep.mubr.msk.f32.mxu1 %vm11470_vm1, %v11469_v1 }
  0xe2   : > { %11231 = vmatprep.subr.mxu0 %v11469_v1  ;;  %11236 = vmatprep.subr.mxu1 %v11469_v1 }
  0xe3   : > { %11224 = vmatmul.mubr.msk.f32.vlgmr.msra.gmra.mrb[100].mxu0 %vm329_vm2, %v11911_v43  ;;  %11229 = vmatmul.mubr.msk.f32.vlgmr.msra.gmra.mrb[100].mxu1 %vm329_vm2, %v11926_v44 }
  0xe4   : > { %11232 = vmatpush3.msk.msra.mxu0 %vm333_vm0, %v10366_v8  ;;  %11237 = vmatpush3.msk.msra.mxu1 %vm333_vm0, %v10366_v8 }
  0xe5   : > { %11233 = vmatprep.mubr.msk.f32.mxu0 %vm11470_vm1, %v11469_v1  ;;  %11238 = vmatprep.mubr.msk.f32.mxu1 %vm11470_vm1, %v11469_v1 }
  0xe6   : > { %11241 = vmatprep.subr.mxu0 %v11469_v1  ;;  %11246 = vmatprep.subr.mxu1 %v11469_v1 }
  0xe7   : > { %11234 = vmatmul.mubr.msk.f32.vlgmr.msra.gmra.mrb[102].mxu0 %vm329_vm2, %v11929_v45  ;;  %11239 = vmatmul.mubr.msk.f32.vlgmr.msra.gmra.mrb[102].mxu1 %vm329_vm2, %v10365_v9 }
  0xe8   : > { %11242 = vmatpush3.msk.msra.mxu0 %vm333_vm0, %v10391_v14  ;;  %11247 = vmatpush3.msk.msra.mxu1 %vm333_vm0, %v10391_v14 }
  0xe9   : > { %11243 = vmatprep.mubr.msk.f32.mxu0 %vm11470_vm1, %v11469_v1  ;;  %11248 = vmatprep.mubr.msk.f32.mxu1 %vm11470_vm1, %v11469_v1 }
  0xea   : > { %11251 = vmatprep.subr.mxu0 %v11469_v1  ;;  %11256 = vmatprep.subr.mxu1 %v11469_v1 }
  0xeb   : > { %11244 = vmatmul.mubr.msk.f32.vlgmr.msra.gmra.mrb[104].mxu0 %vm329_vm2, %v11954_v48  ;;  %11249 = vmatmul.mubr.msk.f32.vlgmr.msra.gmra.mrb[104].mxu1 %vm329_vm2, %v11968_v49 }
  0xec   : > { %11252 = vmatpush3.msk.msra.mxu0 %vm333_vm0, %v10391_v14  ;;  %11257 = vmatpush3.msk.msra.mxu1 %vm333_vm0, %v10391_v14 }
  0xed   : > { %11253 = vmatprep.mubr.msk.f32.mxu0 %vm11470_vm1, %v11469_v1  ;;  %11258 = vmatprep.mubr.msk.f32.mxu1 %vm11470_vm1, %v11469_v1 }
  0xee   : > { %v403_v15 = vpop.f32.mrb[0].mxu0  ;;  %v476_v16 = vpop.f32.mrb[0].mxu1  ;;  %11261 = vmatprep.subr.mxu0 %v11469_v1  ;;  %11266 = vmatprep.subr.mxu1 %v11469_v1 }
  0xef   : > { %v10725_v17 = vpop.f32.mrb[1].mxu0  ;;  %v10730_v18 = vpop.f32.mrb[1].mxu1  ;;  %11254 = vmatmul.mubr.msk.f32.vlgmr.msra.gmra.mrb[106].mxu0 %vm329_vm2, %v11971_v50  ;;  %11259 = vmatmul.mubr.msk.f32.vlgmr.msra.gmra.mrb[106].mxu1 %vm329_vm2, %v11986_v51  ;;  %v10415_v51 = vld [vmem:[%s11864_s16 + $0x81] sm:$0xff]  ;;  %s287_s16 = sand.u32 1, %s11459_s22  }
  0xf0   : > { %11262 = vmatpush3.msk.msra.mxu0 %vm333_vm0, %v10391_v14  ;;  %11267 = vmatpush3.msk.msra.mxu1 %vm333_vm0, %v10391_v14  ;;  %s10118_s28 = sshll.u32 %s287_s16, 6  ;;  %s12596_s25 = scalar_lea.sflag [#allocation3], %s287_s16 }
  0xf1   : > { %11263 = vmatprep.mubr.msk.f32.mxu0 %vm11470_vm1, %v11469_v1  ;;  %11268 = vmatprep.mubr.msk.f32.mxu1 %vm11470_vm1, %v11469_v1  ;;  %s12575_s19 = scalar_lea.vmem [#allocation2], %s10118_s28 }
  0xf2   : > { %v549_v21 = vpop.f32.mrb[2].mxu0  ;;  %v622_v22 = vpop.f32.mrb[2].mxu1  ;;  %11271 = vmatprep.subr.mxu0 %v11469_v1  ;;  %11276 = vmatprep.subr.mxu1 %v11469_v1  ;;  %s10016_s12 = sshll.u32 %s12575_s19, 4  ;;  %s12590_s12 = int_to_ptr.vmem [resolvable:$true] %s10016_s12 }
  0xf3   : > { %v10735_v23 = vpop.f32.mrb[3].mxu0  ;;  %v10740_v24 = vpop.f32.mrb[3].mxu1  ;;  %11264 = vmatmul.mubr.msk.f32.vlgmr.msra.gmra.mrb[108].mxu0 %vm329_vm2, %v11989_v52  ;;  %11269 = vmatmul.mubr.msk.f32.vlgmr.msra.gmra.mrb[108].mxu1 %vm329_vm2, %v12004_v53  ;;  %v10441_v52 = vld [vmem:[%s12641_s4 + $0x3c] sm:$0xf]  ;;  %s11405_s9 = scalar_lea.vmem %s12590_s12, 1024  ;;  %p11412_p0 = scmp.lt.s32.totalorder %s12590_s12, %s11410_s11 }
  0xf4   : > { %11272 = vmatpush3.msk.msra.mxu0 %vm333_vm0, %v10391_v14  ;;  %11277 = vmatpush3.msk.msra.mxu1 %vm333_vm0, %v10391_v14  ;;  %p11406_p11 = scmp.ne.s32.totalorder %s12590_s12, %s11405_s9  ;;  %p11413_p1 = scmp.lt.s32.totalorder %s11411_s13, %s11405_s9 }
  0xf5   : > { %11273 = vmatprep.mubr.msk.f32.mxu0 %vm11470_vm1, %v11469_v1  ;;  %11278 = vmatprep.mubr.msk.f32.mxu1 %vm11470_vm1, %v11469_v1 }
  0xf6   : > { %v695_v27 = vpop.f32.mrb[4].mxu0  ;;  %v768_v30 = vpop.f32.mrb[4].mxu1  ;;  %11281 = vmatprep.subr.mxu0 %v11469_v1  ;;  %11286 = vmatprep.subr.mxu1 %v11469_v1  ;;  %p11407_p12 = pnand %p11406_p11, %p11547_p5  ;;  %p11414_p2 = por %p11413_p1, %p11412_p0 }
  0xf7   : > { %v10745_v31 = vpop.f32.mrb[5].mxu0  ;;  %v10750_v32 = vpop.f32.mrb[5].mxu1  ;;  %11274 = vmatmul.mubr.msk.f32.vlgmr.msra.gmra.mrb[110].mxu0 %vm329_vm2, %v12007_v54  ;;  %11279 = vmatmul.mubr.msk.f32.vlgmr.msra.gmra.mrb[110].mxu1 %vm329_vm2, %v10390_v25 }
  0xf8   : > { %11282 = vmatpush3.msk.msra.mxu0 %vm333_vm0, %v10416_v26  ;;  %11287 = vmatpush3.msk.msra.mxu1 %vm333_vm0, %v10416_v26  ;;  %p11408_p13 = pneg %p11407_p12 }
  0xf9   : > { %11283 = vmatprep.mubr.msk.f32.mxu0 %vm11470_vm1, %v11469_v1  ;;  %11288 = vmatprep.mubr.msk.f32.mxu1 %vm11470_vm1, %v11469_v1 }
  0xfa   : > { %v841_v33 = vpop.f32.mrb[6].mxu0  ;;  %v914_v34 = vpop.f32.mrb[6].mxu1  ;;  %11291 = vmatprep.subr.mxu0 %v11469_v1  ;;  %11296 = vmatprep.subr.mxu1 %v11469_v1  ;;  %p11415_p3 = pnand %p11414_p2, %p11408_p13 }
  0xfb   : > { %v10755_v35 = vpop.f32.mrb[7].mxu0  ;;  %v10760_v36 = vpop.f32.mrb[7].mxu1  ;;  %11284 = vmatmul.mubr.msk.f32.vlgmr.msra.gmra.mrb[112].mxu0 %vm329_vm2, %v12026_v57  ;;  %11289 = vmatmul.mubr.msk.f32.vlgmr.msra.gmra.mrb[112].mxu1 %vm329_vm2, %v12040_v58 }
  0xfc   : > { %11292 = vmatpush3.msk.msra.mxu0 %vm333_vm0, %v10416_v26  ;;  %11297 = vmatpush3.msk.msra.mxu1 %vm333_vm0, %v10416_v26 }
  0xfd   : > { %11293 = vmatprep.mubr.msk.f32.mxu0 %vm11470_vm1, %v11469_v1  ;;  %11298 = vmatprep.mubr.msk.f32.mxu1 %vm11470_vm1, %v11469_v1 }
  0xfe   : > { %v990_v39 = vpop.f32.mrb[8].mxu0  ;;  %v1063_v40 = vpop.f32.mrb[8].mxu1  ;;  %11301 = vmatprep.subr.mxu0 %v11469_v1  ;;  %11306 = vmatprep.subr.mxu1 %v11469_v1 }
  0xff   : > { %v991_v41 = vadd.f32 %v990_v39, %v403_v15  ;;  %v1064_v42 = vadd.f32 %v1063_v40, %v476_v16  ;;  %v10765_v43 = vpop.f32.mrb[9].mxu0  ;;  %v10770_v44 = vpop.f32.mrb[9].mxu1  ;;  %11294 = vmatmul.mubr.msk.f32.vlgmr.msra.gmra.mrb[114].mxu0 %vm329_vm2, %v12043_v59  ;;  %11299 = vmatmul.mubr.msk.f32.vlgmr.msra.gmra.mrb[114].mxu1 %vm329_vm2, %v12058_v60 }
 0x100   : > { %11302 = vmatpush3.msk.msra.mxu0 %vm333_vm0, %v10416_v26  ;;  %11307 = vmatpush3.msk.msra.mxu1 %vm333_vm0, %v10416_v26 }
 0x101   : > { %11303 = vmatprep.mubr.msk.f32.mxu0 %vm11470_vm1, %v11469_v1  ;;  %11308 = vmatprep.mubr.msk.f32.mxu1 %vm11470_vm1, %v11469_v1 }
 0x102   : > { %v1136_v45 = vpop.f32.mrb[10].mxu0  ;;  %v1209_v46 = vpop.f32.mrb[10].mxu1  ;;  %11311 = vmatprep.subr.mxu0 %v11469_v1  ;;  %11316 = vmatprep.subr.mxu1 %v11469_v1 }
 0x103   : > { %v1137_v47 = vadd.f32 %v1136_v45, %v549_v21  ;;  %v1210_v48 = vadd.f32 %v1209_v46, %v622_v22  ;;  %v10775_v49 = vpop.f32.mrb[11].mxu0  ;;  %v10780_v50 = vpop.f32.mrb[11].mxu1  ;;  %11304 = vmatmul.mubr.msk.f32.vlgmr.msra.gmra.mrb[116].mxu0 %vm329_vm2, %v12061_v61  ;;  %11309 = vmatmul.mubr.msk.f32.vlgmr.msra.gmra.mrb[116].mxu1 %vm329_vm2, %v12076_v62 }
 0x104   : > { %11312 = vmatpush3.msk.msra.mxu0 %vm333_vm0, %v10416_v26  ;;  %11317 = vmatpush3.msk.msra.mxu1 %vm333_vm0, %v10416_v26 }
 0x105   : > { %11313 = vmatprep.mubr.msk.f32.mxu0 %vm11470_vm1, %v11469_v1  ;;  %11318 = vmatprep.mubr.msk.f32.mxu1 %vm11470_vm1, %v11469_v1 }
 0x106   : > { %v1282_v53 = vpop.f32.mrb[12].mxu0  ;;  %v1355_v54 = vpop.f32.mrb[12].mxu1  ;;  %11321 = vmatprep.subr.mxu0 %v11469_v1  ;;  %11326 = vmatprep.subr.mxu1 %v11469_v1 }
 0x107   : > { %v1283_v55 = vadd.f32 %v1282_v53, %v695_v27  ;;  %v1356_v56 = vadd.f32 %v1355_v54, %v768_v30  ;;  %v10785_v57 = vpop.f32.mrb[13].mxu0  ;;  %v10790_v58 = vpop.f32.mrb[13].mxu1  ;;  %11314 = vmatmul.mubr.msk.f32.vlgmr.msra.gmra.mrb[118].mxu0 %vm329_vm2, %v12079_v63  ;;  %11319 = vmatmul.mubr.msk.f32.vlgmr.msra.gmra.mrb[118].mxu1 %vm329_vm2, %v10415_v51 }
 0x108   : > { %11322 = vmatpush3.msk.msra.mxu0 %vm333_vm0, %v10441_v52  ;;  %11327 = vmatpush3.msk.msra.mxu1 %vm333_vm0, %v10441_v52 }
 0x109   : > { %11323 = vmatprep.mubr.msk.f32.mxu0 %vm11470_vm1, %v11469_v1  ;;  %11328 = vmatprep.mubr.msk.f32.mxu1 %vm11470_vm1, %v11469_v1 }
 0x10a   : > { %v1428_v59 = vpop.f32.mrb[14].mxu0  ;;  %v1501_v60 = vpop.f32.mrb[14].mxu1  ;;  %11331 = vmatprep.subr.mxu0 %v11469_v1  ;;  %11336 = vmatprep.subr.mxu1 %v11469_v1 }
 0x10b   : > { %v1429_v61 = vadd.f32 %v1428_v59, %v841_v33  ;;  %v1502_v62 = vadd.f32 %v1501_v60, %v914_v34  ;;  %v10795_v63 = vpop.f32.mrb[15].mxu0  ;;  %v10800_v0 = vpop.f32.mrb[15].mxu1  ;;  %11324 = vmatmul.mubr.msk.f32.vlgmr.msra.gmra.mrb[120].mxu0 %vm329_vm2, %v12098_v10  ;;  %11329 = vmatmul.mubr.msk.f32.vlgmr.msra.gmra.mrb[120].mxu1 %vm329_vm2, %v12112_v11 }
 0x10c   : > { %11332 = vmatpush3.msk.msra.mxu0 %vm333_vm0, %v10441_v52  ;;  %11337 = vmatpush3.msk.msra.mxu1 %vm333_vm0, %v10441_v52 }
 0x10d   : > { %11333 = vmatprep.mubr.msk.f32.mxu0 %vm11470_vm1, %v11469_v1  ;;  %11338 = vmatprep.mubr.msk.f32.mxu1 %vm11470_vm1, %v11469_v1 }
 0x10e   : > { %v1587_v2 = vpop.f32.mrb[16].mxu0  ;;  %v1660_v38 = vpop.f32.mrb[16].mxu1  ;;  %11341 = vmatprep.subr.mxu0 %v11469_v1  ;;  %11346 = vmatprep.subr.mxu1 %v11469_v1 }
 0x10f   : > { %v2102_v10 = vadd.f32 %v1587_v2, %v991_v41  ;;  %v2103_v12 = vadd.f32 %v1660_v38, %v1064_v42  ;;  %v10805_v13 = vpop.f32.mrb[17].mxu0  ;;  %v10810_v11 = vpop.f32.mrb[17].mxu1  ;;  %11334 = vmatmul.mubr.msk.f32.vlgmr.msra.gmra.mrb[122].mxu0 %vm329_vm2, %v12115_v19  ;;  %11339 = vmatmul.mubr.msk.f32.vlgmr.msra.gmra.mrb[122].mxu1 %vm329_vm2, %v12130_v20 }
 0x110   : > { %11342 = vmatpush3.msk.msra.mxu0 %vm333_vm0, %v10441_v52  ;;  %11347 = vmatpush3.msk.msra.mxu1 %vm333_vm0, %v10441_v52 }
 0x111   : > { %11343 = vmatprep.mubr.msk.f32.mxu0 %vm11470_vm1, %v11469_v1  ;;  %11348 = vmatprep.mubr.msk.f32.mxu1 %vm11470_vm1, %v11469_v1 }
 0x112   : > { %v1733_v3 = vpop.f32.mrb[18].mxu0  ;;  %v1806_v4 = vpop.f32.mrb[18].mxu1  ;;  %11351 = vmatprep.subr.mxu0 %v11469_v1  ;;  %11356 = vmatprep.subr.mxu1 %v11469_v1 }
 0x113   : > { %v2104_v19 = vadd.f32 %v1733_v3, %v1137_v47  ;;  %v2105_v5 = vadd.f32 %v1806_v4, %v1210_v48  ;;  %v10815_v20 = vpop.f32.mrb[19].mxu0  ;;  %v10820_v6 = vpop.f32.mrb[19].mxu1  ;;  %11344 = vmatmul.mubr.msk.f32.vlgmr.msra.gmra.mrb[124].mxu0 %vm329_vm2, %v12133_v28  ;;  %11349 = vmatmul.mubr.msk.f32.vlgmr.msra.gmra.mrb[124].mxu1 %vm329_vm2, %v12148_v29 }
 0x114   : > { %11352 = vmatpush3.msk.msra.mxu0 %vm333_vm0, %v10441_v52  ;;  %11357 = vmatpush3.msk.msra.mxu1 %vm333_vm0, %v10441_v52 }
 0x115   : > { %11353 = vmatprep.mubr.msk.f32.mxu0 %vm11470_vm1, %v11469_v1  ;;  %11358 = vmatprep.mubr.msk.f32.mxu1 %vm11470_vm1, %v11469_v1 }
 0x116   : > { %v1879_v8 = vpop.f32.mrb[20].mxu0  ;;  %v1952_v9 = vpop.f32.mrb[20].mxu1 }
 0x117   : > { %v2106_v14 = vadd.f32 %v1879_v8, %v1283_v55  ;;  %v2107_v15 = vadd.f32 %v1952_v9, %v1356_v56  ;;  %v10825_v16 = vpop.f32.mrb[21].mxu0  ;;  %v10830_v28 = vpop.f32.mrb[21].mxu1  ;;  %11354 = vmatmul.mubr.msk.f32.vlgmr.msra.gmra.mrb[126].mxu0 %vm329_vm2, %v12151_v37  ;;  %11359 = vmatmul.mubr.msk.f32.vlgmr.msra.gmra.mrb[126].mxu1 %vm329_vm2, %v10440_v7 }
 0x11a   : > { %v2025_v29 = vpop.f32.mrb[22].mxu0  ;;  %v2098_v17 = vpop.f32.mrb[22].mxu1 }
 0x11b   : > { %v2108_v18 = vadd.f32 %v2025_v29, %v1429_v61  ;;  %v2109_v21 = vadd.f32 %v2098_v17, %v1502_v62  ;;  %v10835_v22 = vpop.f32.mrb[23].mxu0  ;;  %v10840_v23 = vpop.f32.mrb[23].mxu1 }
 0x11e   : > { %v2192_v24 = vpop.f32.mrb[24].mxu0  ;;  %v2265_v25 = vpop.f32.mrb[24].mxu1 }
 0x11f   : > { %v2707_v1 = vadd.f32 %v2192_v24, %v2102_v10  ;;  %v2708_v26 = vadd.f32 %v2265_v25, %v2103_v12  ;;  %v10845_v27 = vpop.f32.mrb[25].mxu0  ;;  %v10850_v30 = vpop.f32.mrb[25].mxu1 }
 0x122   : > { %v2338_v31 = vpop.f32.mrb[26].mxu0  ;;  %v2411_v32 = vpop.f32.mrb[26].mxu1 }
 0x123   : > { %v2709_v33 = vadd.f32 %v2338_v31, %v2104_v19  ;;  %v2710_v34 = vadd.f32 %v2411_v32, %v2105_v5  ;;  %v10855_v35 = vpop.f32.mrb[27].mxu0  ;;  %v10860_v37 = vpop.f32.mrb[27].mxu1 }
 0x126   : > { %v2484_v36 = vpop.f32.mrb[28].mxu0  ;;  %v2557_v39 = vpop.f32.mrb[28].mxu1 }
 0x127   : > { %v2711_v40 = vadd.f32 %v2484_v36, %v2106_v14  ;;  %v2712_v41 = vadd.f32 %v2557_v39, %v2107_v15  ;;  %v10865_v42 = vpop.f32.mrb[29].mxu0  ;;  %v10870_v43 = vpop.f32.mrb[29].mxu1 }
 0x12a   : > { %v2630_v44 = vpop.f32.mrb[30].mxu0  ;;  %v2703_v45 = vpop.f32.mrb[30].mxu1 }
 0x12b   : > { %v2713_v46 = vadd.f32 %v2630_v44, %v2108_v18  ;;  %v2714_v47 = vadd.f32 %v2703_v45, %v2109_v21  ;;  %v10875_v48 = vpop.f32.mrb[31].mxu0  ;;  %v10880_v49 = vpop.f32.mrb[31].mxu1 }
 0x12e   : > { %v2797_v50 = vpop.f32.mrb[32].mxu0  ;;  %v2870_v51 = vpop.f32.mrb[32].mxu1 }
 0x12f   : > { %v3312_v52 = vadd.f32 %v2797_v50, %v2707_v1  ;;  %v3313_v53 = vadd.f32 %v2870_v51, %v2708_v26  ;;  %v10885_v54 = vpop.f32.mrb[33].mxu0  ;;  %v10890_v55 = vpop.f32.mrb[33].mxu1 }
 0x132   : > { %v2943_v56 = vpop.f32.mrb[34].mxu0  ;;  %v3016_v57 = vpop.f32.mrb[34].mxu1 }
 0x133   : > { %v3314_v58 = vadd.f32 %v2943_v56, %v2709_v33  ;;  %v3315_v59 = vadd.f32 %v3016_v57, %v2710_v34  ;;  %v10895_v60 = vpop.f32.mrb[35].mxu0  ;;  %v10900_v61 = vpop.f32.mrb[35].mxu1 }
 0x136   : > { %v3089_v62 = vpop.f32.mrb[36].mxu0  ;;  %v3162_v63 = vpop.f32.mrb[36].mxu1 }
 0x137   : > { %v3316_v0 = vadd.f32 %v3089_v62, %v2711_v40  ;;  %v3317_v2 = vadd.f32 %v3162_v63, %v2712_v41  ;;  %v10905_v38 = vpop.f32.mrb[37].mxu0  ;;  %v10910_v10 = vpop.f32.mrb[37].mxu1 }
 0x13a   : > { %v3235_v12 = vpop.f32.mrb[38].mxu0  ;;  %v3308_v13 = vpop.f32.mrb[38].mxu1 }
 0x13b   : > { %v3318_v11 = vadd.f32 %v3235_v12, %v2713_v46  ;;  %v3319_v3 = vadd.f32 %v3308_v13, %v2714_v47  ;;  %v10915_v4 = vpop.f32.mrb[39].mxu0  ;;  %v10920_v19 = vpop.f32.mrb[39].mxu1 }
 0x13e   : > { %v3402_v5 = vpop.f32.mrb[40].mxu0  ;;  %v3475_v20 = vpop.f32.mrb[40].mxu1 }
 0x13f   : > { %v3917_v6 = vadd.f32 %v3402_v5, %v3312_v52  ;;  %v3918_v7 = vadd.f32 %v3475_v20, %v3313_v53  ;;  %v10925_v8 = vpop.f32.mrb[41].mxu0  ;;  %v10930_v9 = vpop.f32.mrb[41].mxu1 }
 0x142   : > { %v3548_v14 = vpop.f32.mrb[42].mxu0  ;;  %v3621_v15 = vpop.f32.mrb[42].mxu1 }
 0x143   : > { %v3919_v16 = vadd.f32 %v3548_v14, %v3314_v58  ;;  %v3920_v28 = vadd.f32 %v3621_v15, %v3315_v59  ;;  %v10935_v29 = vpop.f32.mrb[43].mxu0  ;;  %v10940_v17 = vpop.f32.mrb[43].mxu1 }
 0x146   : > { %v3694_v18 = vpop.f32.mrb[44].mxu0  ;;  %v3767_v21 = vpop.f32.mrb[44].mxu1 }
 0x147   : > { %v3921_v22 = vadd.f32 %v3694_v18, %v3316_v0  ;;  %v3922_v23 = vadd.f32 %v3767_v21, %v3317_v2  ;;  %v10945_v24 = vpop.f32.mrb[45].mxu0  ;;  %v10950_v25 = vpop.f32.mrb[45].mxu1 }
 0x14a   : > { %v3840_v1 = vpop.f32.mrb[46].mxu0  ;;  %v3913_v26 = vpop.f32.mrb[46].mxu1 }
 0x14b   : > { %v3923_v27 = vadd.f32 %v3840_v1, %v3318_v11  ;;  %v3924_v30 = vadd.f32 %v3913_v26, %v3319_v3  ;;  %v10955_v31 = vpop.f32.mrb[47].mxu0  ;;  %v10960_v32 = vpop.f32.mrb[47].mxu1 }
 0x14e   : > { %v4007_v33 = vpop.f32.mrb[48].mxu0  ;;  %v4080_v34 = vpop.f32.mrb[48].mxu1 }
 0x14f   : > { %v4522_v35 = vadd.f32 %v4007_v33, %v3917_v6  ;;  %v4523_v37 = vadd.f32 %v4080_v34, %v3918_v7  ;;  %v10965_v36 = vpop.f32.mrb[49].mxu0  ;;  %v10970_v39 = vpop.f32.mrb[49].mxu1 }
 0x152   : > { %v4153_v40 = vpop.f32.mrb[50].mxu0  ;;  %v4226_v41 = vpop.f32.mrb[50].mxu1 }
 0x153   : > { %v4524_v42 = vadd.f32 %v4153_v40, %v3919_v16  ;;  %v4525_v43 = vadd.f32 %v4226_v41, %v3920_v28  ;;  %v10975_v44 = vpop.f32.mrb[51].mxu0  ;;  %v10980_v45 = vpop.f32.mrb[51].mxu1 }
 0x156   : > { %v4299_v46 = vpop.f32.mrb[52].mxu0  ;;  %v4372_v47 = vpop.f32.mrb[52].mxu1 }
 0x157   : > { %v4526_v48 = vadd.f32 %v4299_v46, %v3921_v22  ;;  %v4527_v49 = vadd.f32 %v4372_v47, %v3922_v23  ;;  %v10985_v50 = vpop.f32.mrb[53].mxu0  ;;  %v10990_v51 = vpop.f32.mrb[53].mxu1 }
 0x15a   : > { %v4445_v52 = vpop.f32.mrb[54].mxu0  ;;  %v4518_v53 = vpop.f32.mrb[54].mxu1 }
 0x15b   : > { %v4528_v54 = vadd.f32 %v4445_v52, %v3923_v27  ;;  %v4529_v55 = vadd.f32 %v4518_v53, %v3924_v30  ;;  %v10995_v56 = vpop.f32.mrb[55].mxu0  ;;  %v11000_v57 = vpop.f32.mrb[55].mxu1 }
 0x15e   : > { %v4612_v58 = vpop.f32.mrb[56].mxu0  ;;  %v4685_v59 = vpop.f32.mrb[56].mxu1 }
 0x15f   : > { %v5127_v60 = vadd.f32 %v4612_v58, %v4522_v35  ;;  %v5128_v61 = vadd.f32 %v4685_v59, %v4523_v37  ;;  %v11005_v62 = vpop.f32.mrb[57].mxu0  ;;  %v11010_v63 = vpop.f32.mrb[57].mxu1 }
 0x162   : > { %v4758_v0 = vpop.f32.mrb[58].mxu0  ;;  %v4831_v2 = vpop.f32.mrb[58].mxu1 }
 0x163   : > { %v5129_v38 = vadd.f32 %v4758_v0, %v4524_v42  ;;  %v5130_v10 = vadd.f32 %v4831_v2, %v4525_v43  ;;  %v11015_v12 = vpop.f32.mrb[59].mxu0  ;;  %v11020_v13 = vpop.f32.mrb[59].mxu1 }
 0x166   : > { %v4904_v11 = vpop.f32.mrb[60].mxu0  ;;  %v4977_v3 = vpop.f32.mrb[60].mxu1 }
 0x167   : > { %v5131_v4 = vadd.f32 %v4904_v11, %v4526_v48  ;;  %v5132_v19 = vadd.f32 %v4977_v3, %v4527_v49  ;;  %v11025_v5 = vpop.f32.mrb[61].mxu0  ;;  %v11030_v20 = vpop.f32.mrb[61].mxu1 }
 0x16a   : > { %v5050_v6 = vpop.f32.mrb[62].mxu0  ;;  %v5123_v7 = vpop.f32.mrb[62].mxu1 }
 0x16b   : > { %v5133_v8 = vadd.f32 %v5050_v6, %v4528_v54  ;;  %v5134_v9 = vadd.f32 %v5123_v7, %v4529_v55  ;;  %v11035_v14 = vpop.f32.mrb[63].mxu0  ;;  %v11040_v15 = vpop.f32.mrb[63].mxu1 }
 0x16e   : > { %v5218_v16 = vpop.f32.mrb[64].mxu0  ;;  %v5291_v28 = vpop.f32.mrb[64].mxu1 }
 0x16f   : > { %v5733_v29 = vadd.f32 %v5218_v16, %v5127_v60  ;;  %v5734_v17 = vadd.f32 %v5291_v28, %v5128_v61  ;;  %v11045_v18 = vpop.f32.mrb[65].mxu0  ;;  %v11050_v21 = vpop.f32.mrb[65].mxu1 }
 0x172   : > { %v5364_v22 = vpop.f32.mrb[66].mxu0  ;;  %v5437_v23 = vpop.f32.mrb[66].mxu1 }
 0x173   : > { %v5735_v24 = vadd.f32 %v5364_v22, %v5129_v38  ;;  %v5736_v25 = vadd.f32 %v5437_v23, %v5130_v10  ;;  %v11055_v1 = vpop.f32.mrb[67].mxu0  ;;  %v11060_v26 = vpop.f32.mrb[67].mxu1 }
 0x176   : > { %v5510_v27 = vpop.f32.mrb[68].mxu0  ;;  %v5583_v30 = vpop.f32.mrb[68].mxu1 }
 0x177   : > { %v5737_v31 = vadd.f32 %v5510_v27, %v5131_v4  ;;  %v5738_v32 = vadd.f32 %v5583_v30, %v5132_v19  ;;  %v11065_v33 = vpop.f32.mrb[69].mxu0  ;;  %v11070_v34 = vpop.f32.mrb[69].mxu1 }
 0x17a   : > { %v5656_v35 = vpop.f32.mrb[70].mxu0  ;;  %v5729_v37 = vpop.f32.mrb[70].mxu1 }
 0x17b   : > { %v5739_v36 = vadd.f32 %v5656_v35, %v5133_v8  ;;  %v5740_v39 = vadd.f32 %v5729_v37, %v5134_v9  ;;  %v11075_v40 = vpop.f32.mrb[71].mxu0  ;;  %v11080_v41 = vpop.f32.mrb[71].mxu1 }
 0x17e   : > { %v5824_v42 = vpop.f32.mrb[72].mxu0  ;;  %v5897_v43 = vpop.f32.mrb[72].mxu1 }
 0x17f   : > { %v6339_v44 = vadd.f32 %v5824_v42, %v5733_v29  ;;  %v6340_v45 = vadd.f32 %v5897_v43, %v5734_v17  ;;  %v11085_v46 = vpop.f32.mrb[73].mxu0  ;;  %v11090_v47 = vpop.f32.mrb[73].mxu1 }
 0x182   : > { %v5970_v48 = vpop.f32.mrb[74].mxu0  ;;  %v6043_v49 = vpop.f32.mrb[74].mxu1 }
 0x183   : > { %v6341_v50 = vadd.f32 %v5970_v48, %v5735_v24  ;;  %v6342_v51 = vadd.f32 %v6043_v49, %v5736_v25  ;;  %v11095_v52 = vpop.f32.mrb[75].mxu0  ;;  %v11100_v53 = vpop.f32.mrb[75].mxu1 }
 0x186   : > { %v6116_v54 = vpop.f32.mrb[76].mxu0  ;;  %v6189_v55 = vpop.f32.mrb[76].mxu1 }
 0x187   : > { %v6343_v56 = vadd.f32 %v6116_v54, %v5737_v31  ;;  %v6344_v57 = vadd.f32 %v6189_v55, %v5738_v32  ;;  %v11105_v58 = vpop.f32.mrb[77].mxu0  ;;  %v11110_v59 = vpop.f32.mrb[77].mxu1 }
 0x18a   : > { %v6262_v60 = vpop.f32.mrb[78].mxu0  ;;  %v6335_v61 = vpop.f32.mrb[78].mxu1 }
 0x18b   : > { %v6345_v62 = vadd.f32 %v6262_v60, %v5739_v36  ;;  %v6346_v63 = vadd.f32 %v6335_v61, %v5740_v39  ;;  %v11115_v0 = vpop.f32.mrb[79].mxu0  ;;  %v11120_v2 = vpop.f32.mrb[79].mxu1 }
 0x18e   : > { %v6429_v38 = vpop.f32.mrb[80].mxu0  ;;  %v6502_v10 = vpop.f32.mrb[80].mxu1 }
 0x18f   : > { %v6944_v12 = vadd.f32 %v6429_v38, %v6339_v44  ;;  %v6945_v13 = vadd.f32 %v6502_v10, %v6340_v45  ;;  %v11125_v11 = vpop.f32.mrb[81].mxu0  ;;  %v11130_v3 = vpop.f32.mrb[81].mxu1 }
 0x192   : > { %v6575_v4 = vpop.f32.mrb[82].mxu0  ;;  %v6648_v19 = vpop.f32.mrb[82].mxu1 }
 0x193   : > { %v6946_v5 = vadd.f32 %v6575_v4, %v6341_v50  ;;  %v6947_v20 = vadd.f32 %v6648_v19, %v6342_v51  ;;  %v11135_v6 = vpop.f32.mrb[83].mxu0  ;;  %v11140_v7 = vpop.f32.mrb[83].mxu1 }
 0x196   : > { %v6721_v8 = vpop.f32.mrb[84].mxu0  ;;  %v6794_v9 = vpop.f32.mrb[84].mxu1 }
 0x197   : > { %v6948_v14 = vadd.f32 %v6721_v8, %v6343_v56  ;;  %v6949_v15 = vadd.f32 %v6794_v9, %v6344_v57  ;;  %v11145_v16 = vpop.f32.mrb[85].mxu0  ;;  %v11150_v28 = vpop.f32.mrb[85].mxu1 }
 0x19a   : > { %v6867_v29 = vpop.f32.mrb[86].mxu0  ;;  %v6940_v17 = vpop.f32.mrb[86].mxu1 }
 0x19b   : > { %v6950_v18 = vadd.f32 %v6867_v29, %v6345_v62  ;;  %v6951_v21 = vadd.f32 %v6940_v17, %v6346_v63  ;;  %v11155_v22 = vpop.f32.mrb[87].mxu0  ;;  %v11160_v23 = vpop.f32.mrb[87].mxu1 }
 0x19e   : > { %v7034_v24 = vpop.f32.mrb[88].mxu0  ;;  %v7107_v25 = vpop.f32.mrb[88].mxu1 }
 0x19f   : > { %v7549_v1 = vadd.f32 %v7034_v24, %v6944_v12  ;;  %v7550_v26 = vadd.f32 %v7107_v25, %v6945_v13  ;;  %v11165_v27 = vpop.f32.mrb[89].mxu0  ;;  %v11170_v30 = vpop.f32.mrb[89].mxu1 }
 0x1a2   : > { %v7180_v31 = vpop.f32.mrb[90].mxu0  ;;  %v7253_v32 = vpop.f32.mrb[90].mxu1 }
 0x1a3   : > { %v7551_v33 = vadd.f32 %v7180_v31, %v6946_v5  ;;  %v7552_v34 = vadd.f32 %v7253_v32, %v6947_v20  ;;  %v11175_v35 = vpop.f32.mrb[91].mxu0  ;;  %v11180_v37 = vpop.f32.mrb[91].mxu1 }
 0x1a6   : > { %v7326_v36 = vpop.f32.mrb[92].mxu0  ;;  %v7399_v39 = vpop.f32.mrb[92].mxu1 }
 0x1a7   : > { %v7553_v40 = vadd.f32 %v7326_v36, %v6948_v14  ;;  %v7554_v41 = vadd.f32 %v7399_v39, %v6949_v15  ;;  %v11185_v42 = vpop.f32.mrb[93].mxu0  ;;  %v11190_v43 = vpop.f32.mrb[93].mxu1 }
 0x1aa   : > { %v7472_v44 = vpop.f32.mrb[94].mxu0  ;;  %v7545_v45 = vpop.f32.mrb[94].mxu1 }
 0x1ab   : > { %v7555_v46 = vadd.f32 %v7472_v44, %v6950_v18  ;;  %v7556_v47 = vadd.f32 %v7545_v45, %v6951_v21  ;;  %v11195_v48 = vpop.f32.mrb[95].mxu0  ;;  %v11200_v49 = vpop.f32.mrb[95].mxu1 }
 0x1ae   : > { %v7640_v50 = vpop.f32.mrb[96].mxu0  ;;  %v7713_v51 = vpop.f32.mrb[96].mxu1 }
 0x1af   : > { %v8155_v52 = vadd.f32 %v7640_v50, %v7549_v1  ;;  %v8156_v53 = vadd.f32 %v7713_v51, %v7550_v26  ;;  %v11205_v54 = vpop.f32.mrb[97].mxu0  ;;  %v11210_v55 = vpop.f32.mrb[97].mxu1 }
 0x1b2   : > { %v7786_v56 = vpop.f32.mrb[98].mxu0  ;;  %v7859_v57 = vpop.f32.mrb[98].mxu1 }
 0x1b3   : > { %v8157_v58 = vadd.f32 %v7786_v56, %v7551_v33  ;;  %v8158_v59 = vadd.f32 %v7859_v57, %v7552_v34  ;;  %v11215_v60 = vpop.f32.mrb[99].mxu0  ;;  %v11220_v61 = vpop.f32.mrb[99].mxu1 }
 0x1b6   : > { %v7932_v62 = vpop.f32.mrb[100].mxu0  ;;  %v8005_v63 = vpop.f32.mrb[100].mxu1 }
 0x1b7   : > { %v8159_v0 = vadd.f32 %v7932_v62, %v7553_v40  ;;  %v8160_v2 = vadd.f32 %v8005_v63, %v7554_v41  ;;  %v11225_v38 = vpop.f32.mrb[101].mxu0  ;;  %v11230_v10 = vpop.f32.mrb[101].mxu1 }
 0x1ba   : > { %v8078_v12 = vpop.f32.mrb[102].mxu0  ;;  %v8151_v13 = vpop.f32.mrb[102].mxu1 }
 0x1bb   : > { %v8161_v11 = vadd.f32 %v8078_v12, %v7555_v46  ;;  %v8162_v3 = vadd.f32 %v8151_v13, %v7556_v47  ;;  %v11235_v4 = vpop.f32.mrb[103].mxu0  ;;  %v11240_v19 = vpop.f32.mrb[103].mxu1 }
 0x1be   : > { %v8246_v5 = vpop.f32.mrb[104].mxu0  ;;  %v8319_v20 = vpop.f32.mrb[104].mxu1 }
 0x1bf   : > { %v8761_v6 = vadd.f32 %v8246_v5, %v8155_v52  ;;  %v8762_v7 = vadd.f32 %v8319_v20, %v8156_v53  ;;  %v11245_v8 = vpop.f32.mrb[105].mxu0  ;;  %v11250_v9 = vpop.f32.mrb[105].mxu1 }
 0x1c2   : > { %v8392_v14 = vpop.f32.mrb[106].mxu0  ;;  %v8465_v15 = vpop.f32.mrb[106].mxu1 }
 0x1c3   : > { %v8763_v16 = vadd.f32 %v8392_v14, %v8157_v58  ;;  %v8764_v28 = vadd.f32 %v8465_v15, %v8158_v59  ;;  %v11255_v29 = vpop.f32.mrb[107].mxu0  ;;  %v11260_v17 = vpop.f32.mrb[107].mxu1  ;;  %v10458_v59 = vld [vmem:[%s12642_s5] ss:$0 sm:$0xff] }
 0x1c6   : > { %v8538_v18 = vpop.f32.mrb[108].mxu0  ;;  %v8611_v21 = vpop.f32.mrb[108].mxu1 }
 0x1c7   : > { %v8765_v22 = vadd.f32 %v8538_v18, %v8159_v0  ;;  %v8766_v23 = vadd.f32 %v8611_v21, %v8160_v2  ;;  %v11265_v24 = vpop.f32.mrb[109].mxu0  ;;  %v11270_v25 = vpop.f32.mrb[109].mxu1 }
 0x1ca   : > { %v8684_v1 = vpop.f32.mrb[110].mxu0  ;;  %v8757_v26 = vpop.f32.mrb[110].mxu1 }
 0x1cb   : > { %v8767_v27 = vadd.f32 %v8684_v1, %v8161_v11  ;;  %v8768_v30 = vadd.f32 %v8757_v26, %v8162_v3  ;;  %v11275_v31 = vpop.f32.mrb[111].mxu0  ;;  %v11280_v32 = vpop.f32.mrb[111].mxu1 }
 0x1ce   : > { %v8851_v33 = vpop.f32.mrb[112].mxu0  ;;  %v8924_v34 = vpop.f32.mrb[112].mxu1 }
 0x1cf   : > { %v9366_v35 = vadd.f32 %v8851_v33, %v8761_v6  ;;  %v9367_v37 = vadd.f32 %v8924_v34, %v8762_v7  ;;  %v11285_v36 = vpop.f32.mrb[113].mxu0  ;;  %v11290_v39 = vpop.f32.mrb[113].mxu1 }
 0x1d2   : > { %v8997_v40 = vpop.f32.mrb[114].mxu0  ;;  %v9070_v41 = vpop.f32.mrb[114].mxu1 }
 0x1d3   : > { %v9368_v42 = vadd.f32 %v8997_v40, %v8763_v16  ;;  %v9369_v43 = vadd.f32 %v9070_v41, %v8764_v28  ;;  %v11295_v44 = vpop.f32.mrb[115].mxu0  ;;  %v11300_v45 = vpop.f32.mrb[115].mxu1 }
 0x1d6   : > { %v9143_v46 = vpop.f32.mrb[116].mxu0  ;;  %v9216_v47 = vpop.f32.mrb[116].mxu1 }
 0x1d7   : > { %v9370_v48 = vadd.f32 %v9143_v46, %v8765_v22  ;;  %v9371_v49 = vadd.f32 %v9216_v47, %v8766_v23  ;;  %v11305_v50 = vpop.f32.mrb[117].mxu0  ;;  %v11310_v51 = vpop.f32.mrb[117].mxu1 }
 0x1da   : > { %v9289_v52 = vpop.f32.mrb[118].mxu0  ;;  %v9362_v53 = vpop.f32.mrb[118].mxu1 }
 0x1db   : > { %v9372_v54 = vadd.f32 %v9289_v52, %v8767_v27  ;;  %v9373_v55 = vadd.f32 %v9362_v53, %v8768_v30  ;;  %v11315_v56 = vpop.f32.mrb[119].mxu0  ;;  %v11320_v57 = vpop.f32.mrb[119].mxu1 }
 0x1de   : > { %v9456_v58 = vpop.f32.mrb[120].mxu0  ;;  %v9529_v60 = vpop.f32.mrb[120].mxu1 }
 0x1df   : > { %v9971_v61 = vadd.f32 %v9456_v58, %v9366_v35  ;;  %v9972_v62 = vadd.f32 %v9529_v60, %v9367_v37  ;;  %v11325_v63 = vpop.f32.mrb[121].mxu0  ;;  %v11330_v0 = vpop.f32.mrb[121].mxu1 }
 0x1e1   : > { %v9986_v2 = vadd.f32 %v10458_v59, %v9971_v61  ;;  %v9987_v38 = vadd.f32 %v10458_v59, %v9972_v62 }
 0x1e2   : > { %v9602_v10 = vpop.f32.mrb[122].mxu0  ;;  %v9675_v12 = vpop.f32.mrb[122].mxu1 }
 0x1e3   : > { %9994 = vst [vmem:[%s12575_s19] sm:$0xff] %v9986_v2  ;;  %9995 = vst [vmem:[%s12575_s19 + $0x8] sm:$0xff] %v9987_v38  ;;  %v9973_v13 = vadd.f32 %v9602_v10, %v9368_v42  ;;  %v9974_v11 = vadd.f32 %v9675_v12, %v9369_v43  ;;  %v11335_v3 = vpop.f32.mrb[123].mxu0  ;;  %v11340_v4 = vpop.f32.mrb[123].mxu1 }
 0x1e5   : > { %v9988_v19 = vadd.f32 %v10458_v59, %v9973_v13  ;;  %v9989_v5 = vadd.f32 %v10458_v59, %v9974_v11 }
 0x1e6   : > { %v9748_v20 = vpop.f32.mrb[124].mxu0  ;;  %v9821_v6 = vpop.f32.mrb[124].mxu1 }
 0x1e7   : > { %9996 = vst [vmem:[%s12575_s19 + $0x10] sm:$0xff] %v9988_v19  ;;  %9997 = vst [vmem:[%s12575_s19 + $0x18] sm:$0xff] %v9989_v5  ;;  %v9975_v7 = vadd.f32 %v9748_v20, %v9370_v48  ;;  %v9976_v8 = vadd.f32 %v9821_v6, %v9371_v49  ;;  %v11345_v9 = vpop.f32.mrb[125].mxu0  ;;  %v11350_v14 = vpop.f32.mrb[125].mxu1 }
 0x1e9   : > { %v9990_v15 = vadd.f32 %v10458_v59, %v9975_v7  ;;  %v9991_v16 = vadd.f32 %v10458_v59, %v9976_v8 }
 0x1ea   : > { %v9894_v28 = vpop.f32.mrb[126].mxu0  ;;  %v9967_v29 = vpop.f32.mrb[126].mxu1 }
 0x1eb   : > { %9998 = vst [vmem:[%s12575_s19 + $0x20] sm:$0xff] %v9990_v15  ;;  %9999 = vst [vmem:[%s12575_s19 + $0x28] sm:$0xff] %v9991_v16  ;;  %v9977_v17 = vadd.f32 %v9894_v28, %v9372_v54  ;;  %v9978_v18 = vadd.f32 %v9967_v29, %v9373_v55  ;;  %v11355_v21 = vpop.f32.mrb[127].mxu0  ;;  %v11360_v22 = vpop.f32.mrb[127].mxu1 }
 0x1ed   : > { %v9992_v23 = vadd.f32 %v10458_v59, %v9977_v17  ;;  %v9993_v24 = vadd.f32 %v10458_v59, %v9978_v18 }
 0x1ef   : > { %10000 = vst [vmem:[%s12575_s19 + $0x30] sm:$0xff] %v9992_v23  ;;  %10001 = vst [vmem:[%s12575_s19 + $0x38] sm:$0xff] %v9993_v24 }
 0x1f0   : > { %11418 = shalt.err (!%p11415_p3)
}
 0x1f1   : > { %s11419_s14 = scalar_lea.hbm %s12588_s15, 1024  ;;  %s11423_s17 = scalar_lea.hbm %s12643_s6, 2048 }
 0x1f2   : > { %p11420_p4 = scmp.ne.s32.totalorder %s12588_s15, %s11419_s14  ;;  %p11424_p9 = scmp.lt.u32.totalorder %s12588_s15, %s12643_s6 }
 0x1f3   : > { %p11425_p10 = scmp.lt.u32.totalorder %s11423_s17, %s11419_s14  ;;  %p11427_p12 = scmp.lt.u32.totalorder %s11419_s14, %s12588_s15 }
 0x1f4   : > { %p11421_p7 = pnand %p11420_p4, %p11547_p5 }
 0x1f5   : > { %p11426_p11 = por %p11425_p10, %p11424_p9 }
 0x1f6   : > { %p11422_p8 = pneg %p11421_p7 }
 0x1f7   : > { %p11428_p13 = por %p11427_p12, %p11426_p11 }
 0x1f9   : > { %p11429_p0 = pnand %p11428_p13, %p11422_p8 }
 0x1fb   : > { %11432 = shalt.err (!%p11429_p0)
}
 0x1fc   : > { %s11472_s26 = smov 128   ;;  %s11473_s20 = smov 8  }
 0x1fd   : > { %11362 = dma.vmem_to_hbm [thread:$0]  (%p11547_p5), %s12590_s12, 1024, %s12588_s15, %s12596_s25, %s11472_s26, %s11472_s26, %s11473_s20  }
 0x1fe PF: > { %p11368_p1 = scmp.ge.s32.totalorder %s11467_s24, 2  ;;  %s10031_s29 = sand.u32 1, %s11455_s21  }
 0x1ff   : > { %s10032_s9 = scalar_lea.sflag [#allocation3], %s10031_s29 }
 0x200   : > { %p11365_p2 = pnand %p11368_p1, %p11551_p6 }
 0x202   : > { %11450 = dma.done.wait (!%p11365_p2), %s10032_s9, 1024  }
 0x203   : > { %11452 = vsyncadd (!%p11365_p2), %s10032_s9, 4294966272  ;;  %p16_p3 = scmp.ge.s32.totalorder %s11534_s27, 4   ;;  %s12646_s21 = smov %s11459_s22 }
 0x204   : > { %s12647_s22 = smov %s11463_s23  ;;  %s12648_s23 = smov %s11545_s30 }
 0x205   : > { %s12649_s24 = smov %s11534_s27  ;;  %18 = sbr.rel (!%p16_p3) target bundleno = 3 (0x3), region = 107 }
 0x20c   :  { %10037 = vsyncpa [#allocation3], 1 }
 0x20d   :  { %10039 = vsyncpa [#allocation3 + $0x1], 1 }

</bundles_post_ra>
